<compile_context>
chip_gen: v7x
topology: tpu7x:2x2x1
jax: 0.10.0
libtpu: 0.0.40
codegen_flags: <defaults>
</compile_context>

<pallas_src>
import jax
import jax.numpy as jnp
from jax import lax
from jax.experimental import pallas as pl
from jax.experimental.pallas import tpu as pltpu


# ------------------------- fused Pallas kernel ----------------------------

def _make_kernel(D, H, W, Cin, Cout):
    Dp, Hp, Wp = D // 2, H // 2, W // 2
    M = Dp * Hp                  # matmul rows = (d, h) pairs
    K1 = (Wp + 2) * Cin          # conv1 contraction = (padded w, ci)
    K2 = (Wp + 2) * Cout         # conv2 contraction
    Nw = Wp * Cout               # lane-dense output width = (w, co)

    def kernel(x_ref, w1_ref, w2_ref, ss_ref, o_ref, pad1_ref, pad2_ref):
        # ---------------- MaxPool3d(kernel=2, stride=2) ----------------
        # x block: (1, D, 2, Hp, 2*Wp*Cin); dims = (d, h-parity, hp, (w-parity,wp,ci))
        xb = x_ref[0]                                        # (D, 2, Hp, 2*Wp*Cin)
        m = jnp.maximum(xb[:, 0], xb[:, 1])                  # h-parity (leading dim: free)
        m = m.reshape(Dp, 2, Hp, 2 * Wp * Cin)
        m = jnp.maximum(m[:, 0], m[:, 1])                    # d-parity (leading dim: free)
        pooled = jnp.maximum(m[..., :Wp * Cin],              # w-parity (lane halves)
                             m[..., Wp * Cin:])              # -> (Dp, Hp, Wp*Cin)

        # -------- conv1 (3x3x3, pad=1) as 9 block-Toeplitz matmuls --------
        # Interior is fully rewritten each step; halo stays zero.
        pad1_ref[...] = jnp.zeros_like(pad1_ref)
        pad1_ref[1:1 + Dp, 1:1 + Hp, Cin:Cin + Wp * Cin] = pooled

        acc = jnp.zeros((M, Nw), jnp.float32)
        for t in range(9):
            kd, kh = t // 3, t % 3
            tap = pad1_ref[kd:kd + Dp, kh:kh + Hp, :]        # (Dp, Hp, K1) full-lane rows
            lhs = tap.reshape(M, K1).astype(jnp.bfloat16)    # tile-aligned row merge
            acc = acc + jnp.dot(lhs, w1_ref[t],
                                preferred_element_type=jnp.float32)
        y1 = jnp.maximum(acc * ss_ref[0:1, :] + ss_ref[1:2, :], 0.0)   # (M, Nw)

        # -------- conv2 (3x3x3, pad=1) + folded BN + ReLU ------------------
        pad2_ref[...] = jnp.zeros_like(pad2_ref)
        pad2_ref[1:1 + Dp, 1:1 + Hp, Cout:Cout + Wp * Cout] = \
            y1.reshape(Dp, Hp, Wp * Cout)

        acc2 = jnp.zeros((M, Nw), jnp.float32)
        for t in range(9):
            kd, kh = t // 3, t % 3
            tap = pad2_ref[kd:kd + Dp, kh:kh + Hp, :]        # (Dp, Hp, K2)
            lhs = tap.reshape(M, K2).astype(jnp.bfloat16)
            acc2 = acc2 + jnp.dot(lhs, w2_ref[t],
                                  preferred_element_type=jnp.float32)
        y2 = jnp.maximum(acc2 * ss_ref[2:3, :] + ss_ref[3:4, :], 0.0)  # (M, Nw)

        # Lane-dense writeback: 64-lane rows, 16 KiB per step.
        o_ref[0] = y2.astype(o_ref.dtype)

    return kernel


# ------------------------- parameter folding ------------------------------

def _toeplitz_conv_weights(w_oidhw, Wp):
    """(Co,Ci,3,3,3) -> (9, (Wp+2)*Ci, Wp*Co) bf16; one w-Toeplitz slab per (kd,kh).

    slab[kd*3+kh][w_in*Ci+ci, w_out*Co+co] = W[co,ci,kd,kh,w_in-w_out]
    if 0 <= w_in - w_out <= 2 else 0 (w_in indexes the zero-padded w axis)."""
    Co, Ci = w_oidhw.shape[0], w_oidhw.shape[1]
    wt = jnp.transpose(w_oidhw, (2, 3, 4, 1, 0))             # (kd, kh, kw, ci, co)
    w_in = jnp.arange(Wp + 2)[:, None]
    w_out = jnp.arange(Wp)[None, :]
    kw = w_in - w_out                                        # (Wp+2, Wp)
    valid = (kw >= 0) & (kw < 3)
    g = wt[:, :, jnp.clip(kw, 0, 2)]                         # (3,3,Wp+2,Wp,Ci,Co)
    g = jnp.where(valid[None, None, :, :, None, None], g, 0.0)
    g = jnp.transpose(g, (0, 1, 2, 4, 3, 5))                 # (3,3,Wp+2,Ci,Wp,Co)
    return g.reshape(9, (Wp + 2) * Ci, Wp * Co).astype(jnp.bfloat16)


def _fold_bn(b, gamma, beta, mean, var, Wp, eps=1e-5):
    """BN(eval)+bias -> per-lane scale/shift tiled over the (w, co) lane layout."""
    scale = gamma / jnp.sqrt(var + eps)
    shift = beta + scale * (b - mean)
    return jnp.tile(scale, Wp), jnp.tile(shift, Wp)          # (Wp*Co,) each


# ------------------------- wrapper ----------------------------------------

@jax.jit
def down_forward(x_ncdhw, params):
    """PyTorch `down.forward`: (N, Cin, D, H, W) -> (N, Cout, D/2, H/2, W/2)."""
    N, Cin, D, H, W = x_ncdhw.shape
    Dp, Hp, Wp = D // 2, H // 2, W // 2
    Cout = params[0][0].shape[0]
    M, Nw = Dp * Hp, Wp * Cout
    K1, K2 = (Wp + 2) * Cin, (Wp + 2) * Cout

    (w1, b1, g1, be1, mu1, v1), (w2, b2, g2, be2, mu2, v2) = params
    w1_t = _toeplitz_conv_weights(w1, Wp)                    # (9, K1, Nw) bf16
    w2_t = _toeplitz_conv_weights(w2, Wp)                    # (9, K2, Nw) bf16
    s1, sh1 = _fold_bn(b1, g1, be1, mu1, v1, Wp)
    s2, sh2 = _fold_bn(b2, g2, be2, mu2, v2, Wp)
    ss = jnp.stack([s1, sh1, s2, sh2], 0).astype(jnp.float32)   # (4, Nw)

    # NCDHW -> lane-dense pool-friendly layout (N, D, h-parity, Hp, (w-parity,Wp,Cin)):
    # both d- and h-parity become leading dims, w-parity is a lane half-split,
    # and the pooled lanes already have the (w, ci) order the conv scratch wants.
    x1 = jnp.transpose(x_ncdhw, (0, 2, 3, 4, 1))             # (N, D, H, W, Cin)
    x2 = x1.reshape(N, D, Hp, 2, Wp, 2, Cin)                 # (N, D, hp, ph, wp, pw, ci)
    x3 = jnp.transpose(x2, (0, 1, 3, 2, 5, 4, 6))            # (N, D, ph, hp, pw, wp, ci)
    xr = x3.reshape(N, D, 2, Hp, 2 * Wp * Cin)               # (N, 16, 2, 8, 64)

    flops = 2 * N * 9 * (M * K1 * Nw + M * K2 * Nw)
    bytes_accessed = (xr.size * 4 + w1_t.size * 2 + w2_t.size * 2
                      + ss.size * 4 + N * M * Nw * 4)

    out = pl.pallas_call(
        _make_kernel(D, H, W, Cin, Cout),
        out_shape=jax.ShapeDtypeStruct((N, M, Nw), jnp.float32),
        grid_spec=pltpu.PrefetchScalarGridSpec(
            num_scalar_prefetch=0,
            grid=(N,),
            in_specs=[
                pl.BlockSpec((1, D, 2, Hp, 2 * Wp * Cin), lambda b: (b, 0, 0, 0, 0)),
                pl.BlockSpec((9, K1, Nw), lambda b: (0, 0, 0)),
                pl.BlockSpec((9, K2, Nw), lambda b: (0, 0, 0)),
                pl.BlockSpec((4, Nw), lambda b: (0, 0)),
            ],
            out_specs=pl.BlockSpec((1, M, Nw), lambda b: (b, 0, 0)),
            scratch_shapes=[
                pltpu.VMEM((Dp + 2, Hp + 2, K1), jnp.float32),   # padded pooled act
                pltpu.VMEM((Dp + 2, Hp + 2, K2), jnp.float32),   # padded conv1 act
            ]),
        compiler_params=pltpu.CompilerParams(
            dimension_semantics=("parallel",)),           # batch over v7x's 2 TCs
        cost_estimate=pl.CostEstimate(flops=flops, transcendentals=0,
                                      bytes_accessed=bytes_accessed),
    )(xr, w1_t, w2_t, ss)

    out = out.reshape(N, Dp, Hp, Wp, Cout)
    return jnp.transpose(out, (0, 4, 1, 2, 3))            # -> NCDHW


# ------------------------- reference (plain JAX) ---------------------------

def ref_forward(x_ncdhw, params, eps=1e-5):
    y = lax.reduce_window(x_ncdhw, -jnp.inf, lax.max,
                          (1, 1, 2, 2, 2), (1, 1, 2, 2, 2), "VALID")
    for (w, b, gamma, beta, mean, var) in params:
        y = lax.conv_general_dilated(
            y, w, window_strides=(1, 1, 1), padding=((1, 1), (1, 1), (1, 1)),
            dimension_numbers=("NCDHW", "OIDHW", "NCDHW"),
            precision=lax.Precision.HIGHEST)
        scale = gamma / jnp.sqrt(var + eps)
        shift = beta + scale * (b - mean)
        y = y * scale[None, :, None, None, None] + shift[None, :, None, None, None]
        y = jnp.maximum(y, 0.0)
    return y


# ------------------------- main --------------------------------------------

if __name__ == "__main__":
    key = jax.random.PRNGKey(0)
    N, Cin, Cout, D, H, W = 2, 4, 8, 16, 16, 16

    k = jax.random.split(key, 16)
    x = jax.random.normal(k[0], (N, Cin, D, H, W), jnp.float32)

    def make_conv_bn(kw, kb, kg, kbe, ci, co):
        fan_in = ci * 27
        w = jax.random.normal(kw, (co, ci, 3, 3, 3), jnp.float32) / jnp.sqrt(fan_in)
        b = jax.random.normal(kb, (co,), jnp.float32) * 0.05
        gamma = 1.0 + 0.1 * jax.random.normal(kg, (co,), jnp.float32)
        beta = 0.1 * jax.random.normal(kbe, (co,), jnp.float32)
        mean = jnp.zeros((co,), jnp.float32)   # BatchNorm3d running stats (eval mode)
        var = jnp.ones((co,), jnp.float32)
        return (w, b, gamma, beta, mean, var)

    params = (
        make_conv_bn(k[1], k[2], k[3], k[4], Cin, Cout),   # conv3d #1
        make_conv_bn(k[5], k[6], k[7], k[8], Cout, Cout),  # conv3d #2
    )

    out = jax.block_until_ready(down_forward(x, params))
    assert out.shape == (N, Cout, D // 2, H // 2, W // 2), out.shape

    ref = jax.block_until_ready(ref_forward(x, params))
    # bf16 MXU operands + f32 accumulation -> expected max |err| ~1e-2
    err = float(jnp.max(jnp.abs(out - ref)))
    assert jnp.allclose(out, ref, atol=2e-2, rtol=2e-2), err

    print("KERNEL_OK")
</pallas_src>

<mosaic_0001>
module attributes {stable_mosaic.version = 11 : i64} {
  func.func @kernel(%arg0: i32, %arg1: memref<1x16x2x8x64xf32, #tpu.memory_space<vmem>>, %arg2: memref<9x40x64xbf16, #tpu.memory_space<vmem>>, %arg3: memref<9x80x64xbf16, #tpu.memory_space<vmem>>, %arg4: memref<4x64xf32, #tpu.memory_space<vmem>>, %arg5: memref<1x64x64xf32, #tpu.memory_space<vmem>>, %arg6: memref<10x10x40xf32, #tpu.memory_space<vmem>>, %arg7: memref<10x10x80xf32, #tpu.memory_space<vmem>>) attributes {dimension_semantics = [#tpu.dimension_semantics<parallel>], iteration_bounds = array<i64: 2>, scalar_prefetch = 0 : i64, scratch_operands = 2 : i64, tpu.core_type = #tpu.core_type<tc>, window_params = [{transform_indices = @transform_0, window_bounds = array<i64: 1, 16, 2, 8, 64>}, {pipeline_mode = #tpu.pipeline_mode<synchronous>, transform_indices = @transform_1, window_bounds = array<i64: 9, 40, 64>}, {pipeline_mode = #tpu.pipeline_mode<synchronous>, transform_indices = @transform_2, window_bounds = array<i64: 9, 80, 64>}, {pipeline_mode = #tpu.pipeline_mode<synchronous>, transform_indices = @transform_3, window_bounds = array<i64: 4, 64>}, {transform_indices = @transform_4, window_bounds = array<i64: 1, 64, 64>}]} {
    %c0 = arith.constant 0 : index
    %c0_0 = arith.constant 0 : index
    %c0_1 = arith.constant 0 : index
    %c0_2 = arith.constant 0 : index
    %c0_3 = arith.constant 0 : index
    %0 = vector.load %arg1[%c0, %c0_0, %c0_1, %c0_2, %c0_3] : memref<1x16x2x8x64xf32, #tpu.memory_space<vmem>>, vector<1x16x2x8x64xf32>
    %1 = vector.shape_cast %0 : vector<1x16x2x8x64xf32> to vector<16x2x8x64xf32>
    %2 = vector.extract_strided_slice %1 {offsets = [0, 0, 0, 0], sizes = [16, 1, 8, 64], strides = [1, 1, 1, 1]} : vector<16x2x8x64xf32> to vector<16x1x8x64xf32>
    %3 = vector.shape_cast %2 : vector<16x1x8x64xf32> to vector<16x8x64xf32>
    %4 = vector.extract_strided_slice %1 {offsets = [0, 1, 0, 0], sizes = [16, 1, 8, 64], strides = [1, 1, 1, 1]} : vector<16x2x8x64xf32> to vector<16x1x8x64xf32>
    %5 = vector.shape_cast %4 : vector<16x1x8x64xf32> to vector<16x8x64xf32>
    %6 = arith.maximumf %3, %5 : vector<16x8x64xf32>
    %7 = vector.shape_cast %6 : vector<16x8x64xf32> to vector<8x2x8x64xf32>
    %8 = vector.extract_strided_slice %7 {offsets = [0, 0, 0, 0], sizes = [8, 1, 8, 64], strides = [1, 1, 1, 1]} : vector<8x2x8x64xf32> to vector<8x1x8x64xf32>
    %9 = vector.shape_cast %8 : vector<8x1x8x64xf32> to vector<8x8x64xf32>
    %10 = vector.extract_strided_slice %7 {offsets = [0, 1, 0, 0], sizes = [8, 1, 8, 64], strides = [1, 1, 1, 1]} : vector<8x2x8x64xf32> to vector<8x1x8x64xf32>
    %11 = vector.shape_cast %10 : vector<8x1x8x64xf32> to vector<8x8x64xf32>
    %12 = arith.maximumf %9, %11 : vector<8x8x64xf32>
    %13 = vector.extract_strided_slice %12 {offsets = [0, 0, 0], sizes = [8, 8, 32], strides = [1, 1, 1]} : vector<8x8x64xf32> to vector<8x8x32xf32>
    %14 = vector.extract_strided_slice %12 {offsets = [0, 0, 32], sizes = [8, 8, 32], strides = [1, 1, 1]} : vector<8x8x64xf32> to vector<8x8x32xf32>
    %15 = arith.maximumf %13, %14 : vector<8x8x32xf32>
    %cst = arith.constant 0.000000e+00 : f32
    %16 = vector.broadcast %cst : f32 to vector<10x10x40xf32>
    %c0_4 = arith.constant 0 : index
    %c0_5 = arith.constant 0 : index
    %c0_6 = arith.constant 0 : index
    %17 = vector.load %arg6[%c0_4, %c0_5, %c0_6] : memref<10x10x40xf32, #tpu.memory_space<vmem>>, vector<10x10x40xf32>
    tpu.vector_store %arg6[%c0_4, %c0_5, %c0_6], %16 {strides = array<i32>} : memref<10x10x40xf32, #tpu.memory_space<vmem>>, vector<10x10x40xf32>,
    %c1 = arith.constant 1 : index
    %c1_7 = arith.constant 1 : index
    %c4 = arith.constant 4 : index
    %18 = vector.load %arg6[%c1, %c1_7, %c4] : memref<10x10x40xf32, #tpu.memory_space<vmem>>, vector<8x8x32xf32>
    tpu.vector_store %arg6[%c1, %c1_7, %c4], %15 {strides = array<i32>} : memref<10x10x40xf32, #tpu.memory_space<vmem>>, vector<8x8x32xf32>,
    %cst_8 = arith.constant 0.000000e+00 : f32
    %19 = vector.broadcast %cst_8 : f32 to vector<64x64xf32>
    %c0_9 = arith.constant 0 : index
    %c0_10 = arith.constant 0 : index
    %c0_11 = arith.constant 0 : index
    %20 = vector.load %arg6[%c0_9, %c0_10, %c0_11] : memref<10x10x40xf32, #tpu.memory_space<vmem>>, vector<8x8x40xf32>
    %21 = vector.shape_cast %20 : vector<8x8x40xf32> to vector<64x40xf32>
    %22 = arith.truncf %21 : vector<64x40xf32> to vector<64x40xbf16>
    %c0_12 = arith.constant 0 : index
    %c0_13 = arith.constant 0 : index
    %c0_14 = arith.constant 0 : index
    %23 = vector.load %arg2[%c0_12, %c0_13, %c0_14] : memref<9x40x64xbf16, #tpu.memory_space<vmem>>, vector<1x40x64xbf16>
    %24 = vector.shape_cast %23 : vector<1x40x64xbf16> to vector<40x64xbf16>
    %cst_15 = arith.constant dense<0.000000e+00> : vector<64x64xf32>
    %25 = tpu.matmul %22, %24, %cst_15 {dimension_numbers = #tpu.dot_dimension_numbers<[1], [0], [0], [1], [0, 0, 1, 1], [], []>} : vector<64x40xbf16>, vector<40x64xbf16>, vector<64x64xf32> -> vector<64x64xf32>
    %26 = arith.addf %19, %25 : vector<64x64xf32>
    %c0_16 = arith.constant 0 : index
    %c1_17 = arith.constant 1 : index
    %c0_18 = arith.constant 0 : index
    %27 = vector.load %arg6[%c0_16, %c1_17, %c0_18] : memref<10x10x40xf32, #tpu.memory_space<vmem>>, vector<8x8x40xf32>
    %28 = vector.shape_cast %27 : vector<8x8x40xf32> to vector<64x40xf32>
    %29 = arith.truncf %28 : vector<64x40xf32> to vector<64x40xbf16>
    %c1_19 = arith.constant 1 : index
    %c0_20 = arith.constant 0 : index
    %c0_21 = arith.constant 0 : index
    %30 = vector.load %arg2[%c1_19, %c0_20, %c0_21] : memref<9x40x64xbf16, #tpu.memory_space<vmem>>, vector<1x40x64xbf16>
    %31 = vector.shape_cast %30 : vector<1x40x64xbf16> to vector<40x64xbf16>
    %cst_22 = arith.constant dense<0.000000e+00> : vector<64x64xf32>
    %32 = tpu.matmul %29, %31, %cst_22 {dimension_numbers = #tpu.dot_dimension_numbers<[1], [0], [0], [1], [0, 0, 1, 1], [], []>} : vector<64x40xbf16>, vector<40x64xbf16>, vector<64x64xf32> -> vector<64x64xf32>
    %33 = arith.addf %26, %32 : vector<64x64xf32>
    %c0_23 = arith.constant 0 : index
    %c2 = arith.constant 2 : index
    %c0_24 = arith.constant 0 : index
    %34 = vector.load %arg6[%c0_23, %c2, %c0_24] : memref<10x10x40xf32, #tpu.memory_space<vmem>>, vector<8x8x40xf32>
    %35 = vector.shape_cast %34 : vector<8x8x40xf32> to vector<64x40xf32>
    %36 = arith.truncf %35 : vector<64x40xf32> to vector<64x40xbf16>
    %c2_25 = arith.constant 2 : index
    %c0_26 = arith.constant 0 : index
    %c0_27 = arith.constant 0 : index
    %37 = vector.load %arg2[%c2_25, %c0_26, %c0_27] : memref<9x40x64xbf16, #tpu.memory_space<vmem>>, vector<1x40x64xbf16>
    %38 = vector.shape_cast %37 : vector<1x40x64xbf16> to vector<40x64xbf16>
    %cst_28 = arith.constant dense<0.000000e+00> : vector<64x64xf32>
    %39 = tpu.matmul %36, %38, %cst_28 {dimension_numbers = #tpu.dot_dimension_numbers<[1], [0], [0], [1], [0, 0, 1, 1], [], []>} : vector<64x40xbf16>, vector<40x64xbf16>, vector<64x64xf32> -> vector<64x64xf32>
    %40 = arith.addf %33, %39 : vector<64x64xf32>
    %c1_29 = arith.constant 1 : index
    %c0_30 = arith.constant 0 : index
    %c0_31 = arith.constant 0 : index
    %41 = vector.load %arg6[%c1_29, %c0_30, %c0_31] : memref<10x10x40xf32, #tpu.memory_space<vmem>>, vector<8x8x40xf32>
    %42 = vector.shape_cast %41 : vector<8x8x40xf32> to vector<64x40xf32>
    %43 = arith.truncf %42 : vector<64x40xf32> to vector<64x40xbf16>
    %c3 = arith.constant 3 : index
    %c0_32 = arith.constant 0 : index
    %c0_33 = arith.constant 0 : index
    %44 = vector.load %arg2[%c3, %c0_32, %c0_33] : memref<9x40x64xbf16, #tpu.memory_space<vmem>>, vector<1x40x64xbf16>
    %45 = vector.shape_cast %44 : vector<1x40x64xbf16> to vector<40x64xbf16>
    %cst_34 = arith.constant dense<0.000000e+00> : vector<64x64xf32>
    %46 = tpu.matmul %43, %45, %cst_34 {dimension_numbers = #tpu.dot_dimension_numbers<[1], [0], [0], [1], [0, 0, 1, 1], [], []>} : vector<64x40xbf16>, vector<40x64xbf16>, vector<64x64xf32> -> vector<64x64xf32>
    %47 = arith.addf %40, %46 : vector<64x64xf32>
    %c1_35 = arith.constant 1 : index
    %c1_36 = arith.constant 1 : index
    %c0_37 = arith.constant 0 : index
    %48 = vector.load %arg6[%c1_35, %c1_36, %c0_37] : memref<10x10x40xf32, #tpu.memory_space<vmem>>, vector<8x8x40xf32>
    %49 = vector.shape_cast %48 : vector<8x8x40xf32> to vector<64x40xf32>
    %50 = arith.truncf %49 : vector<64x40xf32> to vector<64x40xbf16>
    %c4_38 = arith.constant 4 : index
    %c0_39 = arith.constant 0 : index
    %c0_40 = arith.constant 0 : index
    %51 = vector.load %arg2[%c4_38, %c0_39, %c0_40] : memref<9x40x64xbf16, #tpu.memory_space<vmem>>, vector<1x40x64xbf16>
    %52 = vector.shape_cast %51 : vector<1x40x64xbf16> to vector<40x64xbf16>
    %cst_41 = arith.constant dense<0.000000e+00> : vector<64x64xf32>
    %53 = tpu.matmul %50, %52, %cst_41 {dimension_numbers = #tpu.dot_dimension_numbers<[1], [0], [0], [1], [0, 0, 1, 1], [], []>} : vector<64x40xbf16>, vector<40x64xbf16>, vector<64x64xf32> -> vector<64x64xf32>
    %54 = arith.addf %47, %53 : vector<64x64xf32>
    %c1_42 = arith.constant 1 : index
    %c2_43 = arith.constant 2 : index
    %c0_44 = arith.constant 0 : index
    %55 = vector.load %arg6[%c1_42, %c2_43, %c0_44] : memref<10x10x40xf32, #tpu.memory_space<vmem>>, vector<8x8x40xf32>
    %56 = vector.shape_cast %55 : vector<8x8x40xf32> to vector<64x40xf32>
    %57 = arith.truncf %56 : vector<64x40xf32> to vector<64x40xbf16>
    %c5 = arith.constant 5 : index
    %c0_45 = arith.constant 0 : index
    %c0_46 = arith.constant 0 : index
    %58 = vector.load %arg2[%c5, %c0_45, %c0_46] : memref<9x40x64xbf16, #tpu.memory_space<vmem>>, vector<1x40x64xbf16>
    %59 = vector.shape_cast %58 : vector<1x40x64xbf16> to vector<40x64xbf16>
    %cst_47 = arith.constant dense<0.000000e+00> : vector<64x64xf32>
    %60 = tpu.matmul %57, %59, %cst_47 {dimension_numbers = #tpu.dot_dimension_numbers<[1], [0], [0], [1], [0, 0, 1, 1], [], []>} : vector<64x40xbf16>, vector<40x64xbf16>, vector<64x64xf32> -> vector<64x64xf32>
    %61 = arith.addf %54, %60 : vector<64x64xf32>
    %c2_48 = arith.constant 2 : index
    %c0_49 = arith.constant 0 : index
    %c0_50 = arith.constant 0 : index
    %62 = vector.load %arg6[%c2_48, %c0_49, %c0_50] : memref<10x10x40xf32, #tpu.memory_space<vmem>>, vector<8x8x40xf32>
    %63 = vector.shape_cast %62 : vector<8x8x40xf32> to vector<64x40xf32>
    %64 = arith.truncf %63 : vector<64x40xf32> to vector<64x40xbf16>
    %c6 = arith.constant 6 : index
    %c0_51 = arith.constant 0 : index
    %c0_52 = arith.constant 0 : index
    %65 = vector.load %arg2[%c6, %c0_51, %c0_52] : memref<9x40x64xbf16, #tpu.memory_space<vmem>>, vector<1x40x64xbf16>
    %66 = vector.shape_cast %65 : vector<1x40x64xbf16> to vector<40x64xbf16>
    %cst_53 = arith.constant dense<0.000000e+00> : vector<64x64xf32>
    %67 = tpu.matmul %64, %66, %cst_53 {dimension_numbers = #tpu.dot_dimension_numbers<[1], [0], [0], [1], [0, 0, 1, 1], [], []>} : vector<64x40xbf16>, vector<40x64xbf16>, vector<64x64xf32> -> vector<64x64xf32>
    %68 = arith.addf %61, %67 : vector<64x64xf32>
    %c2_54 = arith.constant 2 : index
    %c1_55 = arith.constant 1 : index
    %c0_56 = arith.constant 0 : index
    %69 = vector.load %arg6[%c2_54, %c1_55, %c0_56] : memref<10x10x40xf32, #tpu.memory_space<vmem>>, vector<8x8x40xf32>
    %70 = vector.shape_cast %69 : vector<8x8x40xf32> to vector<64x40xf32>
    %71 = arith.truncf %70 : vector<64x40xf32> to vector<64x40xbf16>
    %c7 = arith.constant 7 : index
    %c0_57 = arith.constant 0 : index
    %c0_58 = arith.constant 0 : index
    %72 = vector.load %arg2[%c7, %c0_57, %c0_58] : memref<9x40x64xbf16, #tpu.memory_space<vmem>>, vector<1x40x64xbf16>
    %73 = vector.shape_cast %72 : vector<1x40x64xbf16> to vector<40x64xbf16>
    %cst_59 = arith.constant dense<0.000000e+00> : vector<64x64xf32>
    %74 = tpu.matmul %71, %73, %cst_59 {dimension_numbers = #tpu.dot_dimension_numbers<[1], [0], [0], [1], [0, 0, 1, 1], [], []>} : vector<64x40xbf16>, vector<40x64xbf16>, vector<64x64xf32> -> vector<64x64xf32>
    %75 = arith.addf %68, %74 : vector<64x64xf32>
    %c2_60 = arith.constant 2 : index
    %c2_61 = arith.constant 2 : index
    %c0_62 = arith.constant 0 : index
    %76 = vector.load %arg6[%c2_60, %c2_61, %c0_62] : memref<10x10x40xf32, #tpu.memory_space<vmem>>, vector<8x8x40xf32>
    %77 = vector.shape_cast %76 : vector<8x8x40xf32> to vector<64x40xf32>
    %78 = arith.truncf %77 : vector<64x40xf32> to vector<64x40xbf16>
    %c8 = arith.constant 8 : index
    %c0_63 = arith.constant 0 : index
    %c0_64 = arith.constant 0 : index
    %79 = vector.load %arg2[%c8, %c0_63, %c0_64] : memref<9x40x64xbf16, #tpu.memory_space<vmem>>, vector<1x40x64xbf16>
    %80 = vector.shape_cast %79 : vector<1x40x64xbf16> to vector<40x64xbf16>
    %cst_65 = arith.constant dense<0.000000e+00> : vector<64x64xf32>
    %81 = tpu.matmul %78, %80, %cst_65 {dimension_numbers = #tpu.dot_dimension_numbers<[1], [0], [0], [1], [0, 0, 1, 1], [], []>} : vector<64x40xbf16>, vector<40x64xbf16>, vector<64x64xf32> -> vector<64x64xf32>
    %82 = arith.addf %75, %81 : vector<64x64xf32>
    %c0_66 = arith.constant 0 : index
    %c0_67 = arith.constant 0 : index
    %83 = vector.load %arg4[%c0_66, %c0_67] : memref<4x64xf32, #tpu.memory_space<vmem>>, vector<1x64xf32>
    %84 = vector.broadcast %83 : vector<1x64xf32> to vector<64x64xf32>
    %85 = arith.mulf %82, %84 : vector<64x64xf32>
    %c1_68 = arith.constant 1 : index
    %c0_69 = arith.constant 0 : index
    %86 = vector.load %arg4[%c1_68, %c0_69] : memref<4x64xf32, #tpu.memory_space<vmem>>, vector<1x64xf32>
    %87 = vector.broadcast %86 : vector<1x64xf32> to vector<64x64xf32>
    %88 = arith.addf %85, %87 : vector<64x64xf32>
    %cst_70 = arith.constant 0.000000e+00 : f32
    %89 = vector.broadcast %cst_70 : f32 to vector<64x64xf32>
    %90 = arith.maximumf %88, %89 : vector<64x64xf32>
    %cst_71 = arith.constant 0.000000e+00 : f32
    %91 = vector.broadcast %cst_71 : f32 to vector<10x10x80xf32>
    %c0_72 = arith.constant 0 : index
    %c0_73 = arith.constant 0 : index
    %c0_74 = arith.constant 0 : index
    %92 = vector.load %arg7[%c0_72, %c0_73, %c0_74] : memref<10x10x80xf32, #tpu.memory_space<vmem>>, vector<10x10x80xf32>
    tpu.vector_store %arg7[%c0_72, %c0_73, %c0_74], %91 {strides = array<i32>} : memref<10x10x80xf32, #tpu.memory_space<vmem>>, vector<10x10x80xf32>,
    %93 = vector.shape_cast %90 : vector<64x64xf32> to vector<8x8x64xf32>
    %c1_75 = arith.constant 1 : index
    %c1_76 = arith.constant 1 : index
    %c8_77 = arith.constant 8 : index
    %94 = vector.load %arg7[%c1_75, %c1_76, %c8_77] : memref<10x10x80xf32, #tpu.memory_space<vmem>>, vector<8x8x64xf32>
    tpu.vector_store %arg7[%c1_75, %c1_76, %c8_77], %93 {strides = array<i32>} : memref<10x10x80xf32, #tpu.memory_space<vmem>>, vector<8x8x64xf32>,
    %cst_78 = arith.constant 0.000000e+00 : f32
    %95 = vector.broadcast %cst_78 : f32 to vector<64x64xf32>
    %c0_79 = arith.constant 0 : index
    %c0_80 = arith.constant 0 : index
    %c0_81 = arith.constant 0 : index
    %96 = vector.load %arg7[%c0_79, %c0_80, %c0_81] : memref<10x10x80xf32, #tpu.memory_space<vmem>>, vector<8x8x80xf32>
    %97 = vector.shape_cast %96 : vector<8x8x80xf32> to vector<64x80xf32>
    %98 = arith.truncf %97 : vector<64x80xf32> to vector<64x80xbf16>
    %c0_82 = arith.constant 0 : index
    %c0_83 = arith.constant 0 : index
    %c0_84 = arith.constant 0 : index
    %99 = vector.load %arg3[%c0_82, %c0_83, %c0_84] : memref<9x80x64xbf16, #tpu.memory_space<vmem>>, vector<1x80x64xbf16>
    %100 = vector.shape_cast %99 : vector<1x80x64xbf16> to vector<80x64xbf16>
    %cst_85 = arith.constant dense<0.000000e+00> : vector<64x64xf32>
    %101 = tpu.matmul %98, %100, %cst_85 {dimension_numbers = #tpu.dot_dimension_numbers<[1], [0], [0], [1], [0, 0, 1, 1], [], []>} : vector<64x80xbf16>, vector<80x64xbf16>, vector<64x64xf32> -> vector<64x64xf32>
    %102 = arith.addf %95, %101 : vector<64x64xf32>
    %c0_86 = arith.constant 0 : index
    %c1_87 = arith.constant 1 : index
    %c0_88 = arith.constant 0 : index
    %103 = vector.load %arg7[%c0_86, %c1_87, %c0_88] : memref<10x10x80xf32, #tpu.memory_space<vmem>>, vector<8x8x80xf32>
    %104 = vector.shape_cast %103 : vector<8x8x80xf32> to vector<64x80xf32>
    %105 = arith.truncf %104 : vector<64x80xf32> to vector<64x80xbf16>
    %c1_89 = arith.constant 1 : index
    %c0_90 = arith.constant 0 : index
    %c0_91 = arith.constant 0 : index
    %106 = vector.load %arg3[%c1_89, %c0_90, %c0_91] : memref<9x80x64xbf16, #tpu.memory_space<vmem>>, vector<1x80x64xbf16>
    %107 = vector.shape_cast %106 : vector<1x80x64xbf16> to vector<80x64xbf16>
    %cst_92 = arith.constant dense<0.000000e+00> : vector<64x64xf32>
    %108 = tpu.matmul %105, %107, %cst_92 {dimension_numbers = #tpu.dot_dimension_numbers<[1], [0], [0], [1], [0, 0, 1, 1], [], []>} : vector<64x80xbf16>, vector<80x64xbf16>, vector<64x64xf32> -> vector<64x64xf32>
    %109 = arith.addf %102, %108 : vector<64x64xf32>
    %c0_93 = arith.constant 0 : index
    %c2_94 = arith.constant 2 : index
    %c0_95 = arith.constant 0 : index
    %110 = vector.load %arg7[%c0_93, %c2_94, %c0_95] : memref<10x10x80xf32, #tpu.memory_space<vmem>>, vector<8x8x80xf32>
    %111 = vector.shape_cast %110 : vector<8x8x80xf32> to vector<64x80xf32>
    %112 = arith.truncf %111 : vector<64x80xf32> to vector<64x80xbf16>
    %c2_96 = arith.constant 2 : index
    %c0_97 = arith.constant 0 : index
    %c0_98 = arith.constant 0 : index
    %113 = vector.load %arg3[%c2_96, %c0_97, %c0_98] : memref<9x80x64xbf16, #tpu.memory_space<vmem>>, vector<1x80x64xbf16>
    %114 = vector.shape_cast %113 : vector<1x80x64xbf16> to vector<80x64xbf16>
    %cst_99 = arith.constant dense<0.000000e+00> : vector<64x64xf32>
    %115 = tpu.matmul %112, %114, %cst_99 {dimension_numbers = #tpu.dot_dimension_numbers<[1], [0], [0], [1], [0, 0, 1, 1], [], []>} : vector<64x80xbf16>, vector<80x64xbf16>, vector<64x64xf32> -> vector<64x64xf32>
    %116 = arith.addf %109, %115 : vector<64x64xf32>
    %c1_100 = arith.constant 1 : index
    %c0_101 = arith.constant 0 : index
    %c0_102 = arith.constant 0 : index
    %117 = vector.load %arg7[%c1_100, %c0_101, %c0_102] : memref<10x10x80xf32, #tpu.memory_space<vmem>>, vector<8x8x80xf32>
    %118 = vector.shape_cast %117 : vector<8x8x80xf32> to vector<64x80xf32>
    %119 = arith.truncf %118 : vector<64x80xf32> to vector<64x80xbf16>
    %c3_103 = arith.constant 3 : index
    %c0_104 = arith.constant 0 : index
    %c0_105 = arith.constant 0 : index
    %120 = vector.load %arg3[%c3_103, %c0_104, %c0_105] : memref<9x80x64xbf16, #tpu.memory_space<vmem>>, vector<1x80x64xbf16>
    %121 = vector.shape_cast %120 : vector<1x80x64xbf16> to vector<80x64xbf16>
    %cst_106 = arith.constant dense<0.000000e+00> : vector<64x64xf32>
    %122 = tpu.matmul %119, %121, %cst_106 {dimension_numbers = #tpu.dot_dimension_numbers<[1], [0], [0], [1], [0, 0, 1, 1], [], []>} : vector<64x80xbf16>, vector<80x64xbf16>, vector<64x64xf32> -> vector<64x64xf32>
    %123 = arith.addf %116, %122 : vector<64x64xf32>
    %c1_107 = arith.constant 1 : index
    %c1_108 = arith.constant 1 : index
    %c0_109 = arith.constant 0 : index
    %124 = vector.load %arg7[%c1_107, %c1_108, %c0_109] : memref<10x10x80xf32, #tpu.memory_space<vmem>>, vector<8x8x80xf32>
    %125 = vector.shape_cast %124 : vector<8x8x80xf32> to vector<64x80xf32>
    %126 = arith.truncf %125 : vector<64x80xf32> to vector<64x80xbf16>
    %c4_110 = arith.constant 4 : index
    %c0_111 = arith.constant 0 : index
    %c0_112 = arith.constant 0 : index
    %127 = vector.load %arg3[%c4_110, %c0_111, %c0_112] : memref<9x80x64xbf16, #tpu.memory_space<vmem>>, vector<1x80x64xbf16>
    %128 = vector.shape_cast %127 : vector<1x80x64xbf16> to vector<80x64xbf16>
    %cst_113 = arith.constant dense<0.000000e+00> : vector<64x64xf32>
    %129 = tpu.matmul %126, %128, %cst_113 {dimension_numbers = #tpu.dot_dimension_numbers<[1], [0], [0], [1], [0, 0, 1, 1], [], []>} : vector<64x80xbf16>, vector<80x64xbf16>, vector<64x64xf32> -> vector<64x64xf32>
    %130 = arith.addf %123, %129 : vector<64x64xf32>
    %c1_114 = arith.constant 1 : index
    %c2_115 = arith.constant 2 : index
    %c0_116 = arith.constant 0 : index
    %131 = vector.load %arg7[%c1_114, %c2_115, %c0_116] : memref<10x10x80xf32, #tpu.memory_space<vmem>>, vector<8x8x80xf32>
    %132 = vector.shape_cast %131 : vector<8x8x80xf32> to vector<64x80xf32>
    %133 = arith.truncf %132 : vector<64x80xf32> to vector<64x80xbf16>
    %c5_117 = arith.constant 5 : index
    %c0_118 = arith.constant 0 : index
    %c0_119 = arith.constant 0 : index
    %134 = vector.load %arg3[%c5_117, %c0_118, %c0_119] : memref<9x80x64xbf16, #tpu.memory_space<vmem>>, vector<1x80x64xbf16>
    %135 = vector.shape_cast %134 : vector<1x80x64xbf16> to vector<80x64xbf16>
    %cst_120 = arith.constant dense<0.000000e+00> : vector<64x64xf32>
    %136 = tpu.matmul %133, %135, %cst_120 {dimension_numbers = #tpu.dot_dimension_numbers<[1], [0], [0], [1], [0, 0, 1, 1], [], []>} : vector<64x80xbf16>, vector<80x64xbf16>, vector<64x64xf32> -> vector<64x64xf32>
    %137 = arith.addf %130, %136 : vector<64x64xf32>
    %c2_121 = arith.constant 2 : index
    %c0_122 = arith.constant 0 : index
    %c0_123 = arith.constant 0 : index
    %138 = vector.load %arg7[%c2_121, %c0_122, %c0_123] : memref<10x10x80xf32, #tpu.memory_space<vmem>>, vector<8x8x80xf32>
    %139 = vector.shape_cast %138 : vector<8x8x80xf32> to vector<64x80xf32>
    %140 = arith.truncf %139 : vector<64x80xf32> to vector<64x80xbf16>
    %c6_124 = arith.constant 6 : index
    %c0_125 = arith.constant 0 : index
    %c0_126 = arith.constant 0 : index
    %141 = vector.load %arg3[%c6_124, %c0_125, %c0_126] : memref<9x80x64xbf16, #tpu.memory_space<vmem>>, vector<1x80x64xbf16>
    %142 = vector.shape_cast %141 : vector<1x80x64xbf16> to vector<80x64xbf16>
    %cst_127 = arith.constant dense<0.000000e+00> : vector<64x64xf32>
    %143 = tpu.matmul %140, %142, %cst_127 {dimension_numbers = #tpu.dot_dimension_numbers<[1], [0], [0], [1], [0, 0, 1, 1], [], []>} : vector<64x80xbf16>, vector<80x64xbf16>, vector<64x64xf32> -> vector<64x64xf32>
    %144 = arith.addf %137, %143 : vector<64x64xf32>
    %c2_128 = arith.constant 2 : index
    %c1_129 = arith.constant 1 : index
    %c0_130 = arith.constant 0 : index
    %145 = vector.load %arg7[%c2_128, %c1_129, %c0_130] : memref<10x10x80xf32, #tpu.memory_space<vmem>>, vector<8x8x80xf32>
    %146 = vector.shape_cast %145 : vector<8x8x80xf32> to vector<64x80xf32>
    %147 = arith.truncf %146 : vector<64x80xf32> to vector<64x80xbf16>
    %c7_131 = arith.constant 7 : index
    %c0_132 = arith.constant 0 : index
    %c0_133 = arith.constant 0 : index
    %148 = vector.load %arg3[%c7_131, %c0_132, %c0_133] : memref<9x80x64xbf16, #tpu.memory_space<vmem>>, vector<1x80x64xbf16>
    %149 = vector.shape_cast %148 : vector<1x80x64xbf16> to vector<80x64xbf16>
    %cst_134 = arith.constant dense<0.000000e+00> : vector<64x64xf32>
    %150 = tpu.matmul %147, %149, %cst_134 {dimension_numbers = #tpu.dot_dimension_numbers<[1], [0], [0], [1], [0, 0, 1, 1], [], []>} : vector<64x80xbf16>, vector<80x64xbf16>, vector<64x64xf32> -> vector<64x64xf32>
    %151 = arith.addf %144, %150 : vector<64x64xf32>
    %c2_135 = arith.constant 2 : index
    %c2_136 = arith.constant 2 : index
    %c0_137 = arith.constant 0 : index
    %152 = vector.load %arg7[%c2_135, %c2_136, %c0_137] : memref<10x10x80xf32, #tpu.memory_space<vmem>>, vector<8x8x80xf32>
    %153 = vector.shape_cast %152 : vector<8x8x80xf32> to vector<64x80xf32>
    %154 = arith.truncf %153 : vector<64x80xf32> to vector<64x80xbf16>
    %c8_138 = arith.constant 8 : index
    %c0_139 = arith.constant 0 : index
    %c0_140 = arith.constant 0 : index
    %155 = vector.load %arg3[%c8_138, %c0_139, %c0_140] : memref<9x80x64xbf16, #tpu.memory_space<vmem>>, vector<1x80x64xbf16>
    %156 = vector.shape_cast %155 : vector<1x80x64xbf16> to vector<80x64xbf16>
    %cst_141 = arith.constant dense<0.000000e+00> : vector<64x64xf32>
    %157 = tpu.matmul %154, %156, %cst_141 {dimension_numbers = #tpu.dot_dimension_numbers<[1], [0], [0], [1], [0, 0, 1, 1], [], []>} : vector<64x80xbf16>, vector<80x64xbf16>, vector<64x64xf32> -> vector<64x64xf32>
    %158 = arith.addf %151, %157 : vector<64x64xf32>
    %c2_142 = arith.constant 2 : index
    %c0_143 = arith.constant 0 : index
    %159 = vector.load %arg4[%c2_142, %c0_143] : memref<4x64xf32, #tpu.memory_space<vmem>>, vector<1x64xf32>
    %160 = vector.broadcast %159 : vector<1x64xf32> to vector<64x64xf32>
    %161 = arith.mulf %158, %160 : vector<64x64xf32>
    %c3_144 = arith.constant 3 : index
    %c0_145 = arith.constant 0 : index
    %162 = vector.load %arg4[%c3_144, %c0_145] : memref<4x64xf32, #tpu.memory_space<vmem>>, vector<1x64xf32>
    %163 = vector.broadcast %162 : vector<1x64xf32> to vector<64x64xf32>
    %164 = arith.addf %161, %163 : vector<64x64xf32>
    %cst_146 = arith.constant 0.000000e+00 : f32
    %165 = vector.broadcast %cst_146 : f32 to vector<64x64xf32>
    %166 = arith.maximumf %164, %165 : vector<64x64xf32>
    %c0_147 = arith.constant 0 : index
    %c0_148 = arith.constant 0 : index
    %c0_149 = arith.constant 0 : index
    %167 = vector.load %arg5[%c0_147, %c0_148, %c0_149] : memref<1x64x64xf32, #tpu.memory_space<vmem>>, vector<1x64x64xf32>
    %168 = vector.shape_cast %167 : vector<1x64x64xf32> to vector<64x64xf32>
    %169 = vector.shape_cast %166 : vector<64x64xf32> to vector<1x64x64xf32>
    tpu.vector_store %arg5[%c0_147, %c0_148, %c0_149], %169 {strides = array<i32>} : memref<1x64x64xf32, #tpu.memory_space<vmem>>, vector<1x64x64xf32>,
    return
  }
  func.func @transform_0(%arg0: i32) -> (i32, i32, i32, i32, i32) {
    %c0_i32 = arith.constant 0 : i32
    %c0_i32_0 = arith.constant 0 : i32
    %c0_i32_1 = arith.constant 0 : i32
    %c0_i32_2 = arith.constant 0 : i32
    %c0_i32_3 = arith.constant 0 : i32
    return %arg0, %c0_i32, %c0_i32_0, %c0_i32_1, %c0_i32_2 : i32, i32, i32, i32, i32
  }
  func.func @transform_1(%arg0: i32) -> (i32, i32, i32) {
    %c0_i32 = arith.constant 0 : i32
    %c0_i32_0 = arith.constant 0 : i32
    %c0_i32_1 = arith.constant 0 : i32
    %c0_i32_2 = arith.constant 0 : i32
    return %c0_i32, %c0_i32_0, %c0_i32_1 : i32, i32, i32
  }
  func.func @transform_2(%arg0: i32) -> (i32, i32, i32) {
    %c0_i32 = arith.constant 0 : i32
    %c0_i32_0 = arith.constant 0 : i32
    %c0_i32_1 = arith.constant 0 : i32
    %c0_i32_2 = arith.constant 0 : i32
    return %c0_i32, %c0_i32_0, %c0_i32_1 : i32, i32, i32
  }
  func.func @transform_3(%arg0: i32) -> (i32, i32) {
    %c0_i32 = arith.constant 0 : i32
    %c0_i32_0 = arith.constant 0 : i32
    %c0_i32_1 = arith.constant 0 : i32
    return %c0_i32, %c0_i32_0 : i32, i32
  }
  func.func @transform_4(%arg0: i32) -> (i32, i32, i32) {
    %c0_i32 = arith.constant 0 : i32
    %c0_i32_0 = arith.constant 0 : i32
    %c0_i32_1 = arith.constant 0 : i32
    return %arg0, %c0_i32, %c0_i32_0 : i32, i32, i32
  }
}

</mosaic_0001>

<bundles_post_ra>
// kernel: tile.23
= control target key start
LH: loop header
LB: loop body
LE: loop exit
PB: predicated region body
PF: predicated region fallthrough
CT: control target
= control target key end

     0   :  { %s22_s0 = inlined_call_operand.vmem [shape: f32[8], index: 0, kind: input, shape index: {}]   ;;  %s23_s1 = inlined_call_operand.vmem [shape: f32[8,8], index: 1, kind: output, shape index: {}]  }
   0x1   :  { %v4_v0 = vld [vmem:[%s22_s0] ss:$0 sm:$0xff] }
   0x2   :  { %5 = vst [vmem:[%s23_s1] sm:$0xff] %v4_v0 }

// kernel: tile.36
= control target key start
LH: loop header
LB: loop body
LE: loop exit
PB: predicated region body
PF: predicated region fallthrough
CT: control target
= control target key end

     0   :  { %s67_s10 = smov 56   ;;  %s68_s11 = smov 40   ;;  %vm3_vm0 = vcmask 64512   ;;  %vm9_vm1 = vcmask 523712   ;;  %vm15_vm2 = vcmask 458112   ;;  %vm21_vm3 = vcmask 392512   ;;  %s111_s0 = inlined_call_operand.vmem [shape: f32[8,8], index: 0, kind: input, shape index: {}]   ;;  %s112_s1 = inlined_call_operand.vmem [shape: f32[1,64], index: 1, kind: output, shape index: {}]  }
   0x1   :  { %v53_v0 = vld [vmem:[%s111_s0 + $0x7] sm:$0x1]   ;;  %v55_v1 = vld [vmem:[%s111_s0 + $0x5] sm:$0x1]   ;;  %v54_v2 = vld [vmem:[%s111_s0 + $0x6] sm:$0x1]  }
   0x2   :  { %7 = vrot.lane.b32.xlu0 %v53_v0, %s67_s10  ;;  %19 = vrot.lane.b32.xlu1 %v55_v1, %s68_s11  ;;  %v56_v3 = vld [vmem:[%s111_s0 + $0x4] sm:$0x1]   ;;  %v2_v4 = vld [vmem:[%s111_s0] sm:$0x1]   ;;  %s69_s18 = smov 48   ;;  %s70_s19 = smov 32  }
   0x3   :  { %4 = vst.msk [vmem:[#allocation0] sm:$0x1] %vm3_vm0, %v2_v4   ;;  %v57_v5 = vld [vmem:[%s111_s0 + $0x3] sm:$0x1]   ;;  %v58_v6 = vld [vmem:[%s111_s0 + $0x2] sm:$0x1]  }
   0x4   :  { %s71_s24 = smov 24   ;;  %s72_s25 = smov 16   ;;  %v59_v7 = vld [vmem:[%s111_s0 + $0x1] sm:$0x1]   ;;  %vm27_vm4 = vcmask 326912   ;;  %vm33_vm5 = vcmask 261312  }
   0x5   :  { %s73_s0 = smov 8   ;;  %vm39_vm6 = vcmask 195712   ;;  %vm45_vm7 = vcmask 130112  }
   0x6   :  { %13 = vrot.lane.b32.xlu0 %v54_v2, %s69_s18  ;;  %25 = vrot.lane.b32.xlu1 %v56_v3, %s70_s19 }
   0xa   :  { %31 = vrot.lane.b32.xlu0 %v57_v5, %s71_s24  ;;  %37 = vrot.lane.b32.xlu1 %v58_v6, %s72_s25 }
   0xe   :  { %43 = vrot.lane.b32.xlu0 %v59_v7, %s73_s0 }
  0x74   :  { %v8_v8 = vpop.permute.xlu0 %7   ;;  %v20_v9 = vpop.permute.xlu1 %19  }
  0x75   :  { %10 = vst.msk [vmem:[#allocation0] sm:$0x1] %vm9_vm1, %v8_v8  }
  0x78   :  { %v14_v10 = vpop.permute.xlu0 %13   ;;  %v26_v11 = vpop.permute.xlu1 %25  }
  0x79   :  { %16 = vst.msk [vmem:[#allocation0] sm:$0x1] %vm15_vm2, %v14_v10  }
  0x7a   :  { %22 = vst.msk [vmem:[#allocation0] sm:$0x1] %vm21_vm3, %v20_v9  }
  0x7b   :  { %28 = vst.msk [vmem:[#allocation0] sm:$0x1] %vm27_vm4, %v26_v11  }
  0x7c   :  { %v32_v12 = vpop.permute.xlu0 %31   ;;  %v38_v13 = vpop.permute.xlu1 %37  }
  0x7d   :  { %34 = vst.msk [vmem:[#allocation0] sm:$0x1] %vm33_vm5, %v32_v12  }
  0x7e   :  { %40 = vst.msk [vmem:[#allocation0] sm:$0x1] %vm39_vm6, %v38_v13  }
  0x80   :  { %v44_v14 = vpop.permute.xlu0 %43  }
  0x81   :  { %46 = vst.msk [vmem:[#allocation0] sm:$0x1] %vm45_vm7, %v44_v14  }
  0x88   :  { %v50_v15 = vld [vmem:[#allocation0] sm:$0x1] }
  0x89   :  { %52 = vst [vmem:[%s112_s1] sm:$0x1] %v50_v15 }

// kernel: down_forward.1
= control target key start
LH: loop header
LB: loop body
LE: loop exit
PB: predicated region body
PF: predicated region fallthrough
CT: control target
= control target key end

     0   :  { %s3826_s15 = smov 0   ;;  %s4553_s0 = inlined_call_operand.vmem [shape: f32[2,16,2,8,64], index: 0, kind: input, shape index: {}]   ;;  %s4554_s1 = inlined_call_operand.vmem [shape: bf16[9,40,64], index: 1, kind: input, shape index: {}]   ;;  %s4555_s2 = inlined_call_operand.vmem [shape: bf16[9,80,64], index: 2, kind: input, shape index: {}]   ;;  %s4556_s3 = inlined_call_operand.vmem [shape: f32[4,64], index: 3, kind: input, shape index: {}]   ;;  %s4557_s4 = inlined_call_operand.vmem [shape: f32[2,64,64], index: 4, kind: output, shape index: {}]  }
   0x1 LB: > { %s2855_s16 = sadd.s32 4294967295, %s3795_s15   ;;  %p2859_p0 = scmp.ge.s32.totalorder %s3795_s15, 1  ;;  %s3795_s15 = sphi %s3826_s15, %s14_s15  }
   0x2   : > { %p162_p1 = scmp.lt.s32.totalorder %s3795_s15, 3 }
   0x4   : > { %p163_p2 = pnand %p2859_p0, %p162_p1 }
   0x5   : > { %p188_p3 = scmp.lt.s32.totalorder (!%p163_p2), %s2855_s16, 1  ;;  %s3797_s21 = smov (!%p163_p2), 96   ;;  %vm295_vm0 = vcmask (!%p163_p2), 326656   ;;  %vm297_vm1 = vcmask (!%p163_p2), 320512   ;;  %v3798_v54 = vmov (!%p163_p2), 0.0   ;;  %v3717_v57 = vld [vmem:[%s4554_s1 + $0x14] sm:$0xff] (!%p163_p2)  }
   0x6   : > { %166 = sbr.rel (%p163_p2) target bundleno = 1117 (0x45d), region = 36  ;;  %299 = vst.msk [vmem:[#allocation2 + $0x10] sm:$0xff] (!%p163_p2), %vm295_vm0, %v3798_v54  ;;  %296 = vst.msk [vmem:[#allocation2] sm:$0xff] (!%p163_p2), %vm295_vm0, %v3798_v54  ;;  %3280 = vmatprep.subr.bf16.mxu0 (!%p163_p2), %v3717_v57  ;;  %v3718_v58 = vld [vmem:[%s4554_s1 + $0x1c] sm:$0xff] (!%p163_p2)   ;;  %v3719_v59 = vld [vmem:[%s4554_s1 + $0x24] ss:$0 sps:$4 sm:$0xff] (!%p163_p2)  }
   0x7   : > { %300 = vst.msk [vmem:[#allocation2 + $0x18] sm:$0x3] (!%p163_p2), %vm297_vm1, %v3798_v54  ;;  %298 = vst.msk [vmem:[#allocation2 + $0x8] sm:$0x3] (!%p163_p2), %vm297_vm1, %v3798_v54  ;;  %3281 = vmatpush3.bf16.msra.mxu0 (!%p163_p2), %v3717_v57  ;;  %vm421_vm2 = vcmask (!%p163_p2), 1043456   ;;  %s3799_s30 = smov (!%p163_p2), 4  }
   0x8   : > { %301 = vst.msk [vmem:[#allocation2 + $0x20] sm:$0xff] (!%p163_p2), %vm295_vm0, %v3798_v54  ;;  %303 = vst.msk [vmem:[#allocation2 + $0x30] sm:$0xff] (!%p163_p2), %vm295_vm0, %v3798_v54  ;;  %3282 = vmatprep.subr.bf16.mxu0 (!%p163_p2), %v3718_v58  ;;  %v423_v61 = vsel (!%p163_p2), %vm421_vm2, %v3719_v59, 0  ;;  %vm350_vm3 = vcmask (!%p163_p2), 293920   ;;  %vm1467_vm4 = vcmask (!%p163_p2), 654336   ;;  %vm1469_vm5 = vcmask (!%p163_p2), 648192  }
   0x9   : > { %302 = vst.msk [vmem:[#allocation2 + $0x28] sm:$0x3] (!%p163_p2), %vm297_vm1, %v3798_v54  ;;  %304 = vst.msk [vmem:[#allocation2 + $0x38] sm:$0x3] (!%p163_p2), %vm297_vm1, %v3798_v54  ;;  %s3800_s5 = smov (!%p163_p2), 8   ;;  %vm1522_vm6 = vcmask (!%p163_p2), 588864  }
   0xa   : > { %305 = vst.msk [vmem:[#allocation2 + $0x40] sm:$0xff] (!%p163_p2), %vm295_vm0, %v3798_v54  ;;  %307 = vst.msk [vmem:[#allocation2 + $0x50] sm:$0xff] (!%p163_p2), %vm295_vm0, %v3798_v54  ;;  %vm2791_vm7 = vcmask (!%p163_p2), 523264  }
   0xb   : > { %306 = vst.msk [vmem:[#allocation2 + $0x48] sm:$0x3] (!%p163_p2), %vm297_vm1, %v3798_v54  ;;  %308 = vst.msk [vmem:[#allocation2 + $0x58] sm:$0x3] (!%p163_p2), %vm297_vm1, %v3798_v54  ;;  %3283 = vmatpush3.bf16.msra.mxu0 (!%p163_p2), %v3718_v58 }
   0xc   : > { %309 = vst.msk [vmem:[#allocation2 + $0x60] sm:$0xff] (!%p163_p2), %vm295_vm0, %v3798_v54  ;;  %311 = vst.msk [vmem:[#allocation2 + $0x70] sm:$0xff] (!%p163_p2), %vm295_vm0, %v3798_v54  ;;  %3696 = vmatprep.subr.msk.bf16.mxu0 (!%p163_p2), %vm421_vm2, %v3719_v59 }
   0xd   : > { %s4559_s16 = smov (!%p188_p3, %s2855_s16), 1  ;;  %310 = vst.msk [vmem:[#allocation2 + $0x68] sm:$0x3] %vm297_vm1, %v3798_v54  ;;  %312 = vst.msk [vmem:[#allocation2 + $0x78] sm:$0x3] %vm297_vm1, %v3798_v54 }
   0xe   : > { %s3134_s17 = sshll.u32 %s4559_s16, 8  ;;  %313 = vst.msk [vmem:[#allocation2 + $0x80] sm:$0xff] %vm295_vm0, %v3798_v54  ;;  %315 = vst.msk [vmem:[#allocation2 + $0x90] sm:$0xff] %vm295_vm0, %v3798_v54  ;;  %s3135_s6 = sshll.u32 %s4559_s16, 6 }
   0xf   : > { %s3840_s20 = scalar_lea.vmem %s4553_s0, %s3134_s17  ;;  %314 = vst.msk [vmem:[#allocation2 + $0x88] sm:$0x3] %vm297_vm1, %v3798_v54  ;;  %316 = vst.msk [vmem:[#allocation2 + $0x98] sm:$0x3] %vm297_vm1, %v3798_v54  ;;  %3285 = vmatpush3.bf16.msra.mxu0 %v423_v61  ;;  %s4532_s9 = scalar_lea.vmem %s4557_s4, %s3135_s6 }
  0x10   : > { %v199_v0 = vld [vmem:[%s3840_s20] sm:$0xff]  ;;  %v200_v1 = vld [vmem:[%s3840_s20 + $0x8] sm:$0xff]  ;;  %v201_v2 = vld [vmem:[%s3840_s20 + $0x10] sm:$0xff]  ;;  %1471 = vst.msk [vmem:[#allocation3 + $0x10] sm:$0xff] %vm1467_vm4, %v3798_v54 }
  0x11   : > { %v202_v3 = vld [vmem:[%s3840_s20 + $0x18] sm:$0xff]  ;;  %v231_v4 = vmax.f32 %v199_v0, %v200_v1  ;;  %v207_v5 = vld [vmem:[%s3840_s20 + $0x40] sm:$0xff]  ;;  %v208_v6 = vld [vmem:[%s3840_s20 + $0x48] sm:$0xff]  ;;  %1472 = vst.msk [vmem:[#allocation3 + $0x18] sm:$0x3] %vm1469_vm5, %v3798_v54 }
  0x12   : > { %v232_v7 = vmax.f32 %v201_v2, %v202_v3  ;;  %v209_v8 = vld [vmem:[%s3840_s20 + $0x50] sm:$0xff]  ;;  %v210_v9 = vld [vmem:[%s3840_s20 + $0x58] sm:$0xff]  ;;  %v235_v10 = vmax.f32 %v207_v5, %v208_v6  ;;  %v203_v11 = vld [vmem:[%s3840_s20 + $0x20] sm:$0xff]  ;;  %1468 = vst.msk [vmem:[#allocation3] sm:$0xff] %vm1467_vm4, %v3798_v54 }
  0x13   : > { %v236_v12 = vmax.f32 %v209_v8, %v210_v9  ;;  %v204_v13 = vld [vmem:[%s3840_s20 + $0x28] sm:$0xff]  ;;  %v205_v14 = vld [vmem:[%s3840_s20 + $0x30] sm:$0xff]  ;;  %v206_v15 = vld [vmem:[%s3840_s20 + $0x38] sm:$0xff]  ;;  %1470 = vst.msk [vmem:[#allocation3 + $0x8] sm:$0x3] %vm1469_vm5, %v3798_v54 }
  0x14   : > { %v3854_v16 = vmax.f32 %v231_v4, %v232_v7  ;;  %v233_v17 = vmax.f32 %v203_v11, %v204_v13  ;;  %v234_v18 = vmax.f32 %v205_v14, %v206_v15  ;;  %v211_v19 = vld [vmem:[%s3840_s20 + $0x60] sm:$0xff]  ;;  %v212_v20 = vld [vmem:[%s3840_s20 + $0x68] sm:$0xff]  ;;  %v213_v21 = vld [vmem:[%s3840_s20 + $0x70] sm:$0xff]  ;;  %1473 = vst.msk [vmem:[#allocation3 + $0x20] sm:$0xff] %vm1467_vm4, %v3798_v54 }
  0x15   : > { %v3859_v22 = vmax.f32 %v235_v10, %v236_v12  ;;  %v214_v23 = vld [vmem:[%s3840_s20 + $0x78] sm:$0xff]  ;;  %v237_v24 = vmax.f32 %v211_v19, %v212_v20  ;;  %v215_v25 = vld [vmem:[%s3840_s20 + $0x80] sm:$0xff]  ;;  %v216_v26 = vld [vmem:[%s3840_s20 + $0x88] sm:$0xff]  ;;  %1474 = vst.msk [vmem:[#allocation3 + $0x28] sm:$0x3] %vm1469_vm5, %v3798_v54 }
  0x16   : > { %263 = vrot.lane.b32.xlu0 %v3854_v16, %s3797_s21  ;;  %v3866_v27 = vmax.f32 %v233_v17, %v234_v18  ;;  %v238_v28 = vmax.f32 %v213_v21, %v214_v23  ;;  %v217_v29 = vld [vmem:[%s3840_s20 + $0x90] sm:$0xff]  ;;  %v218_v30 = vld [vmem:[%s3840_s20 + $0x98] sm:$0xff]  ;;  %v239_v31 = vmax.f32 %v215_v25, %v216_v26  ;;  %v219_v32 = vld [vmem:[%s3840_s20 + $0xa0] sm:$0xff]  ;;  %1475 = vst.msk [vmem:[#allocation3 + $0x30] sm:$0xff] %vm1467_vm4, %v3798_v54 }
  0x17   : > { %267 = vrot.lane.b32.xlu1 %v3859_v22, %s3797_s21  ;;  %v240_v33 = vmax.f32 %v217_v29, %v218_v30  ;;  %v220_v34 = vld [vmem:[%s3840_s20 + $0xa8] sm:$0xff]  ;;  %v221_v35 = vld [vmem:[%s3840_s20 + $0xb0] sm:$0xff]  ;;  %v222_v36 = vld [vmem:[%s3840_s20 + $0xb8] sm:$0xff]  ;;  %1476 = vst.msk [vmem:[#allocation3 + $0x38] sm:$0x3] %vm1469_vm5, %v3798_v54 }
  0x18   : > { %v3876_v37 = vmax.f32 %v237_v24, %v238_v28  ;;  %v241_v38 = vmax.f32 %v219_v32, %v220_v34  ;;  %v242_v39 = vmax.f32 %v221_v35, %v222_v36  ;;  %v223_v40 = vld [vmem:[%s3840_s20 + $0xc0] sm:$0xff]  ;;  %v224_v41 = vld [vmem:[%s3840_s20 + $0xc8] sm:$0xff]  ;;  %v225_v42 = vld [vmem:[%s3840_s20 + $0xd0] sm:$0xff]  ;;  %1477 = vst.msk [vmem:[#allocation3 + $0x40] sm:$0xff] %vm1467_vm4, %v3798_v54 }
  0x19   : > { %v3881_v43 = vmax.f32 %v239_v31, %v240_v33  ;;  %v226_v44 = vld [vmem:[%s3840_s20 + $0xd8] sm:$0xff]  ;;  %v227_v45 = vld [vmem:[%s3840_s20 + $0xe0] sm:$0xff]  ;;  %v228_v46 = vld [vmem:[%s3840_s20 + $0xe8] sm:$0xff]  ;;  %v243_v48 = vmax.f32 %v223_v40, %v224_v41  ;;  %1478 = vst.msk [vmem:[#allocation3 + $0x48] sm:$0x3] %vm1469_vm5, %v3798_v54 }
  0x1a   : > { %265 = vrot.lane.b32.xlu0 %v3866_v27, %s3797_s21  ;;  %v3888_v47 = vmax.f32 %v241_v38, %v242_v39  ;;  %v244_v49 = vmax.f32 %v225_v42, %v226_v44  ;;  %v229_v50 = vld [vmem:[%s3840_s20 + $0xf0] sm:$0xff]  ;;  %v230_v51 = vld [vmem:[%s3840_s20 + $0xf8] sm:$0xff]  ;;  %v245_v52 = vmax.f32 %v227_v45, %v228_v46  ;;  %v3720_v0 = vld [vmem:[%s4554_s1] sm:$0xff]   ;;  %1479 = vst.msk [vmem:[#allocation3 + $0x50] sm:$0xff] %vm1467_vm4, %v3798_v54 }
  0x1b   : > { %269 = vrot.lane.b32.xlu1 %v3876_v37, %s3797_s21  ;;  %v246_v53 = vmax.f32 %v229_v50, %v230_v51  ;;  %3294 = vmatprep.subr.bf16.mxu0 %v3720_v0  ;;  %v376_v17 = vld [vmem:[#allocation2 + $0x1] sm:$0xff]  ;;  %v3722_v32 = vld [vmem:[%s4554_s1 + $0x10] ss:$0 sps:$4 sm:$0xff]   ;;  %1480 = vst.msk [vmem:[#allocation3 + $0x58] sm:$0x3] %vm1469_vm5, %v3798_v54 }
  0x1c   : > { %v253_v55 = vmax.f32 %v243_v48, %v244_v49  ;;  %v359_v33 = vld [vmem:[#allocation2] sm:$0xff]  ;;  %v518_v38 = vsel %vm421_vm2, %v3722_v32, 0  ;;  %v3723_v39 = vld [vmem:[%s4554_s1 + $0x28] sm:$0xff]   ;;  %v3724_v46 = vld [vmem:[%s4554_s1 + $0x30] sm:$0xff]   ;;  %1481 = vst.msk [vmem:[#allocation3 + $0x60] sm:$0xff] %vm1467_vm4, %v3798_v54 }
  0x1d   : > { %v254_v56 = vmax.f32 %v245_v52, %v246_v53  ;;  %v3725_v48 = vld [vmem:[%s4554_s1 + $0x38] ss:$0 sps:$4 sm:$0xff]   ;;  %v585_v51 = vld [vmem:[#allocation2 + $0x2] sm:$0xff]  ;;  %1482 = vst.msk [vmem:[#allocation3 + $0x68] sm:$0x3] %vm1469_vm5, %v3798_v54 }
  0x1e   : > { %271 = vrot.lane.b32.xlu0 %v3881_v43, %s3797_s21  ;;  %1483 = vst.msk [vmem:[#allocation3 + $0x70] sm:$0xff] %vm1467_vm4, %v3798_v54  ;;  %1485 = vst.msk [vmem:[#allocation3 + $0x80] sm:$0xff] %vm1467_vm4, %v3798_v54 }
  0x1f   : > { %273 = vrot.lane.b32.xlu1 %v3888_v47, %s3797_s21  ;;  %1484 = vst.msk [vmem:[#allocation3 + $0x78] sm:$0x3] %vm1469_vm5, %v3798_v54  ;;  %1486 = vst.msk [vmem:[#allocation3 + $0x88] sm:$0x3] %vm1469_vm5, %v3798_v54 }
  0x20   : > { %1487 = vst.msk [vmem:[#allocation3 + $0x90] sm:$0xff] %vm1467_vm4, %v3798_v54 }
  0x21   : > { %1488 = vst.msk [vmem:[#allocation3 + $0x98] sm:$0x3] %vm1469_vm5, %v3798_v54  ;;  %v2967_v54 = vld [vmem:[%s4556_s3] ss:$0 sm:$0xff] }
  0x22   : > { %275 = vrot.lane.b32.xlu0 %v253_v55, %s3797_s21 }
  0x23   : > { %277 = vrot.lane.b32.xlu1 %v254_v56, %s3797_s21 }
  0x88   : > { %v264_v60 = vpop.permute.xlu0 %263 }
  0x89   : > { %v287_v62 = vmax.f32 %v3854_v16, %v264_v60  ;;  %v268_v63 = vpop.permute.xlu1 %267 }
  0x8a   : > { %v289_v1 = vmax.f32 %v3859_v22, %v268_v63  ;;  %v3727_v63 = vld [vmem:[%s4554_s1 + $0x44] sm:$0xff]  }
  0x8b   : > { %325 = vrot.lane.b32.xlu0 %v287_v62, %s3799_s30 }
  0x8c   : > { %v266_v2 = vpop.permute.xlu0 %265 }
  0x8d   : > { %v288_v3 = vmax.f32 %v3866_v27, %v266_v2  ;;  %v270_v4 = vpop.permute.xlu1 %269  ;;  %v3721_v27 = vld [vmem:[%s4554_s1 + $0x8] sm:$0xff]  }
  0x8e   : > { %v290_v5 = vmax.f32 %v3876_v37, %v270_v4 }
  0x8f   : > { %329 = vrot.lane.b32.xlu0 %v289_v1, %s3799_s30  ;;  %327 = vrot.lane.b32.xlu1 %v288_v3, %s3799_s30  ;;  %v3728_v1 = vld [vmem:[%s4554_s1 + $0x4c] ss:$0 sps:$4 sm:$0xff]  }
  0x90   : > { %v272_v6 = vpop.permute.xlu0 %271 }
  0x91   : > { %v291_v7 = vmax.f32 %v3881_v43, %v272_v6  ;;  %v274_v8 = vpop.permute.xlu1 %273  ;;  %v3729_v6 = vld [vmem:[%s4554_s1 + $0x50] sm:$0xff]  }
  0x92   : > { %v292_v9 = vmax.f32 %v3888_v47, %v274_v8 }
  0x93   : > { %331 = vrot.lane.b32.xlu1 %v290_v5, %s3799_s30  ;;  %333 = vrot.lane.b32.xlu0 %v291_v7, %s3799_s30  ;;  %v752_v5 = vsel %vm421_vm2, %v3728_v1, 0 }
  0x94   : > { %v276_v10 = vpop.permute.xlu0 %275 }
  0x95   : > { %v293_v11 = vmax.f32 %v253_v55, %v276_v10  ;;  %v278_v12 = vpop.permute.xlu1 %277  ;;  %v631_v55 = vsel %vm421_vm2, %v3725_v48, 0 }
  0x96   : > { %v294_v13 = vmax.f32 %v254_v56, %v278_v12  ;;  %v3726_v56 = vld [vmem:[%s4554_s1 + $0x3c] sm:$0xff]  }
  0x97   : > { %335 = vrot.lane.b32.xlu1 %v292_v9, %s3799_s30  ;;  %337 = vrot.lane.b32.xlu0 %v293_v11, %s3799_s30  ;;  %v3730_v9 = vld [vmem:[%s4554_s1 + $0x58] sm:$0xff]   ;;  %v3731_v11 = vld [vmem:[%s4554_s1 + $0x60] ss:$0 sps:$4 sm:$0xff]  }
  0x9b   : > { %339 = vrot.lane.b32.xlu1 %v294_v13, %s3799_s30 }
  0xfd   : > { %v326_v14 = vpop.permute.xlu0 %325 }
  0xfe   : > { %351 = vst.msk [vmem:[#allocation2 + $0x11] sm:$0xff] %vm350_vm3, %v326_v14  ;;  %v873_v14 = vsel %vm421_vm2, %v3731_v11, 0 }
 0x101   : > { %v328_v15 = vpop.permute.xlu1 %327  ;;  %v330_v16 = vpop.permute.xlu0 %329 }
 0x102   : > { %352 = vst.msk [vmem:[#allocation2 + $0x21] sm:$0xff] %vm350_vm3, %v328_v15  ;;  %353 = vst.msk [vmem:[#allocation2 + $0x31] sm:$0xff] %vm350_vm3, %v330_v16  ;;  %v3732_v15 = vld [vmem:[%s4554_s1 + $0x64] sm:$0xff]  }
 0x105   : > { %v332_v18 = vpop.permute.xlu1 %331  ;;  %v334_v19 = vpop.permute.xlu0 %333  ;;  %v3963_v20 = vld [vmem:[#allocation2 + $0x11] sm:$0xff] }
 0x106   : > { %354 = vst.msk [vmem:[#allocation2 + $0x41] sm:$0xff] %vm350_vm3, %v332_v18  ;;  %355 = vst.msk [vmem:[#allocation2 + $0x51] sm:$0xff] %vm350_vm3, %v334_v19  ;;  %v384_v21 = vpack.c.bf16 %v3963_v20, %v376_v17  ;;  %v360_v34 = vld [vmem:[#allocation2 + $0x10] sm:$0xff] }
 0x107   : > { %v367_v40 = vpack.c.bf16 %v360_v34, %v359_v33  ;;  %v4028_v52 = vld [vmem:[#allocation2 + $0x12] sm:$0xff] }
 0x108   : > { %3286 = vmatprep.mubr.msk.bf16.mxu0 %vm295_vm0, %v384_v21  ;;  %v593_v57 = vpack.c.bf16 %v4028_v52, %v585_v51  ;;  %v3733_v18 = vld [vmem:[%s4554_s1 + $0x6c] sm:$0xff]  }
 0x109   : > { %v336_v22 = vpop.permute.xlu1 %335  ;;  %v338_v23 = vpop.permute.xlu0 %337  ;;  %v3969_v24 = vld [vmem:[#allocation2 + $0x21] sm:$0xff]  ;;  %v3971_v25 = vld [vmem:[#allocation2 + $0x31] sm:$0xff] }
 0x10a   : > { %356 = vst.msk [vmem:[#allocation2 + $0x61] sm:$0xff] %vm350_vm3, %v336_v22  ;;  %357 = vst.msk [vmem:[#allocation2 + $0x71] sm:$0xff] %vm350_vm3, %v338_v23  ;;  %v3977_v26 = vpack.c.bf16 %v3971_v25, %v3969_v24  ;;  %v361_v41 = vld [vmem:[#allocation2 + $0x20] sm:$0xff]  ;;  %v362_v42 = vld [vmem:[#allocation2 + $0x30] sm:$0xff]  ;;  %v835_v16 = vpack.c.bf16 %v3969_v24, %v3963_v20 }
 0x10b   : > { %v4014_v45 = vpack.c.bf16 %v362_v42, %v361_v41  ;;  %v587_v58 = vld [vmem:[#allocation2 + $0x22] sm:$0xff]  ;;  %v4041_v59 = vld [vmem:[#allocation2 + $0x32] sm:$0xff]  ;;  %v714_v7 = vpack.c.bf16 %v361_v41, %v360_v34 }
 0x10c   : > { %3287 = vmatmul.mubr.msk.bf16.vlgmr.msra.gmra.mrb[0].mxu0 %vm295_vm0, %v3977_v26  ;;  %v4048_v62 = vpack.c.bf16 %v4041_v59, %v587_v58  ;;  %v3734_v20 = vld [vmem:[%s4554_s1 + $0x74] ss:$0 sps:$4 sm:$0xff]   ;;  %v3735_v24 = vld [vmem:[%s4554_s1 + $0x78] sm:$0xff]  }
 0x10d   : > { %3295 = vmatpush3.bf16.msra.mxu0 %v3720_v0  ;;  %v340_v28 = vpop.permute.xlu1 %339  ;;  %v3984_v29 = vld [vmem:[#allocation2 + $0x41] sm:$0xff]  ;;  %v3986_v30 = vld [vmem:[#allocation2 + $0x51] sm:$0xff]  ;;  %v994_v23 = vsel %vm421_vm2, %v3734_v20, 0 }
 0x10e   : > { %358 = vst.msk [vmem:[#allocation2 + $0x81] sm:$0xff] %vm350_vm3, %v340_v28  ;;  %v3991_v31 = vpack.c.bf16 %v3986_v30, %v3984_v29  ;;  %3296 = vmatprep.subr.bf16.mxu0 %v3721_v27  ;;  %v363_v43 = vld [vmem:[#allocation2 + $0x40] sm:$0xff]  ;;  %v364_v44 = vld [vmem:[#allocation2 + $0x50] sm:$0xff]  ;;  %v836_v17 = vpack.c.bf16 %v3984_v29, %v3971_v25  ;;  %v956_v25 = vpack.c.bf16 %v587_v58, %v4028_v52  ;;  %v3749_v52 = vld [vmem:[%s4555_s2 + $0x38] sm:$0xff]  }
 0x10f   : > { %v4019_v47 = vpack.c.bf16 %v364_v44, %v363_v43  ;;  %v4043_v60 = vld [vmem:[#allocation2 + $0x42] sm:$0xff]  ;;  %v4045_v61 = vld [vmem:[#allocation2 + $0x52] sm:$0xff]  ;;  %v715_v8 = vpack.c.bf16 %v363_v43, %v362_v42 }
 0x110   : > { %3290 = vmatprep.mubr.msk.bf16.mxu0 %vm295_vm0, %v3991_v31  ;;  %v4055_v0 = vpack.c.bf16 %v4045_v61, %v4043_v60  ;;  %v3736_v28 = vld [vmem:[%s4554_s1 + $0x80] sm:$0xff]   ;;  %v3742_v43 = vld [vmem:[%s4554_s1 + $0xa8] sm:$0xff]   ;;  %v3748_v51 = vld [vmem:[%s4555_s2 + $0x10] sm:$0xff]  }
 0x111   : > { %3297 = vmatpush3.bf16.msra.mxu0 %v3721_v27  ;;  %v3998_v35 = vld [vmem:[#allocation2 + $0x61] sm:$0xff]  ;;  %v4000_v36 = vld [vmem:[#allocation2 + $0x71] sm:$0xff]  ;;  %v957_v27 = vpack.c.bf16 %v4043_v60, %v4041_v59 }
 0x112   : > { %v4004_v37 = vpack.c.bf16 %v4000_v36, %v3998_v35  ;;  %3697 = vmatprep.subr.msk.bf16.mxu0 %vm421_vm2, %v3722_v32  ;;  %v365_v49 = vld [vmem:[#allocation2 + $0x60] sm:$0xff]  ;;  %v366_v50 = vld [vmem:[#allocation2 + $0x70] sm:$0xff]  ;;  %v837_v19 = vpack.c.bf16 %v3998_v35, %v3986_v30  ;;  %v3737_v30 = vld [vmem:[%s4554_s1 + $0x88] ss:$0 sps:$4 sm:$0xff]  }
 0x113   : > { %v4030_v53 = vpack.c.bf16 %v366_v50, %v365_v49  ;;  %v591_v2 = vld [vmem:[#allocation2 + $0x62] sm:$0xff]  ;;  %v4064_v3 = vld [vmem:[#allocation2 + $0x72] sm:$0xff]  ;;  %v716_v10 = vpack.c.bf16 %v365_v49, %v364_v44  ;;  %v1116_v34 = vsel %vm421_vm2, %v3737_v30, 0  ;;  %v3743_v44 = vld [vmem:[%s4554_s1 + $0xb0] ss:$0 sps:$4 sm:$0xff]  }
 0x114   : > { %3291 = vmatmul.mubr.msk.bf16.gmra.mrb[4].mxu0 %vm295_vm0, %v4004_v37  ;;  %v4067_v4 = vpack.c.bf16 %v4064_v3, %v591_v2  ;;  %v958_v29 = vpack.c.bf16 %v591_v2, %v4045_v61  ;;  %v3738_v35 = vld [vmem:[%s4554_s1 + $0x8c] sm:$0xff]   ;;  %v3741_v42 = vld [vmem:[%s4554_s1 + $0xa0] sm:$0xff]  }
 0x115   : > { %3300 = vmatprep.mubr.msk.bf16.mxu0 %vm295_vm0, %v367_v40  ;;  %3299 = vmatpush3.bf16.msra.mxu0 %v518_v38  ;;  %v713_v12 = vld [vmem:[#allocation2 + $0x80] sm:$0xff]  ;;  %v3740_v38 = vld [vmem:[%s4554_s1 + $0x9c] ss:$0 sps:$4 sm:$0xff]   ;;  %v3746_v49 = vld [vmem:[%s4555_s2 + $0x8] sm:$0xff]  }
 0x116   : > { %3308 = vmatprep.subr.bf16.mxu0 %v3723_v39  ;;  %v717_v13 = vpack.c.bf16 %v713_v12, %v366_v50  ;;  %v834_v21 = vld [vmem:[#allocation2 + $0x81] sm:$0xff]  ;;  %v1237_v41 = vsel %vm421_vm2, %v3740_v38, 0  ;;  %v3747_v50 = vld [vmem:[%s4555_s2 + $0x30] sm:$0xff]  }
 0x117   : > { %v838_v22 = vpack.c.bf16 %v834_v21, %v4000_v36  ;;  %v955_v32 = vld [vmem:[#allocation2 + $0x82] sm:$0xff]  ;;  %v3739_v36 = vld [vmem:[%s4554_s1 + $0x94] sm:$0xff]  }
 0x118   : > { %v959_v33 = vpack.c.bf16 %v955_v32, %v4064_v3  ;;  %v3753_v3 = vld [vmem:[%s4555_s2 + $0x48] sm:$0xff]  }
 0x11c   : > { %3301 = vmatmul.mubr.msk.bf16.vlgmr.msra.gmra.mrb[0].mxu0 %vm295_vm0, %v4014_v45 }
 0x11d   : > { %3309 = vmatpush3.bf16.msra.mxu0 %v3723_v39  ;;  %3304 = vmatprep.mubr.msk.bf16.mxu0 %vm295_vm0, %v4019_v47  ;;  %v1077_v39 = vld [vmem:[#allocation2 + $0x90] sm:$0xff] }
 0x11e   : > { %3310 = vmatprep.subr.bf16.mxu0 %v3724_v46  ;;  %v1081_v40 = vpack.c.bf16 %v1077_v39, %v713_v12 }
 0x121   : > { %3311 = vmatpush3.bf16.msra.mxu0 %v3724_v46  ;;  %v1358_v46 = vsel %vm421_vm2, %v3743_v44, 0 }
 0x122   : > { %3698 = vmatprep.subr.msk.bf16.mxu0 %vm421_vm2, %v3725_v48  ;;  %v3745_v48 = vld [vmem:[%s4555_s2 + $0x28] sm:$0xff]  }
 0x124   : > { %3305 = vmatmul.mubr.msk.bf16.gmra.mrb[4].mxu0 %vm295_vm0, %v4030_v53 }
 0x125   : > { %3314 = vmatprep.mubr.msk.bf16.mxu0 %vm295_vm0, %v593_v57  ;;  %3313 = vmatpush3.bf16.msra.mxu0 %v631_v55  ;;  %v2968_v57 = vld [vmem:[%s4556_s3 + $0x1] ss:$0 sm:$0xff] }
 0x126   : > { %3322 = vmatprep.subr.bf16.mxu0 %v3726_v56 }
 0x12c   : > { %3315 = vmatmul.mubr.msk.bf16.vlgmr.msra.gmra.mrb[0].mxu0 %vm295_vm0, %v4048_v62 }
 0x12d   : > { %3323 = vmatpush3.bf16.msra.mxu0 %v3726_v56  ;;  %3318 = vmatprep.mubr.msk.bf16.mxu0 %vm295_vm0, %v4055_v0  ;;  %v3751_v56 = vld [vmem:[%s4555_s2 + $0x40] sm:$0xff]  }
 0x12e   : > { %3324 = vmatprep.subr.bf16.mxu0 %v3727_v63 }
 0x131   : > { %3325 = vmatpush3.bf16.msra.mxu0 %v3727_v63  ;;  %v3752_v63 = vld [vmem:[%s4555_s2 + $0x20] sm:$0xff]  }
 0x132   : > { %3699 = vmatprep.subr.msk.bf16.mxu0 %vm421_vm2, %v3728_v1 }
 0x134   : > { %3319 = vmatmul.mubr.msk.bf16.gmra.mrb[4].mxu0 %vm295_vm0, %v4067_v4 }
 0x135   : > { %3328 = vmatprep.mubr.msk.bf16.mxu0 %vm295_vm0, %v714_v7  ;;  %3327 = vmatpush3.bf16.msra.mxu0 %v752_v5  ;;  %v4252_v7 = vld [vmem:[%s4555_s2 + $0x50] sm:$0xff]  }
 0x136   : > { %3336 = vmatprep.subr.bf16.mxu0 %v3729_v6 }
 0x13c   : > { %3329 = vmatmul.mubr.msk.bf16.vlgmr.msra.gmra.mrb[0].mxu0 %vm295_vm0, %v715_v8 }
 0x13d   : > { %3337 = vmatpush3.bf16.msra.mxu0 %v3729_v6  ;;  %3332 = vmatprep.mubr.msk.bf16.mxu0 %vm295_vm0, %v716_v10 }
 0x13e   : > { %3338 = vmatprep.subr.bf16.mxu0 %v3730_v9 }
 0x141   : > { %3339 = vmatpush3.bf16.msra.mxu0 %v3730_v9 }
 0x142   : > { %3700 = vmatprep.subr.msk.bf16.mxu0 %vm421_vm2, %v3731_v11 }
 0x144   : > { %3333 = vmatmul.mubr.msk.bf16.gmra.mrb[4].mxu0 %vm295_vm0, %v717_v13 }
 0x145   : > { %3342 = vmatprep.mubr.msk.bf16.mxu0 %vm295_vm0, %v835_v16  ;;  %3341 = vmatpush3.bf16.msra.mxu0 %v873_v14 }
 0x146   : > { %3350 = vmatprep.subr.bf16.mxu0 %v3732_v15 }
 0x14c   : > { %3343 = vmatmul.mubr.msk.bf16.vlgmr.msra.gmra.mrb[0].mxu0 %vm295_vm0, %v836_v17 }
 0x14d   : > { %3351 = vmatpush3.bf16.msra.mxu0 %v3732_v15  ;;  %3346 = vmatprep.mubr.msk.bf16.mxu0 %vm295_vm0, %v837_v19 }
 0x14e   : > { %3352 = vmatprep.subr.bf16.mxu0 %v3733_v18 }
 0x151   : > { %3353 = vmatpush3.bf16.msra.mxu0 %v3733_v18 }
 0x152   : > { %3701 = vmatprep.subr.msk.bf16.mxu0 %vm421_vm2, %v3734_v20 }
 0x154   : > { %3347 = vmatmul.mubr.msk.bf16.gmra.mrb[4].mxu0 %vm295_vm0, %v838_v22 }
 0x155   : > { %3356 = vmatprep.mubr.msk.bf16.mxu0 %vm295_vm0, %v956_v25  ;;  %3355 = vmatpush3.bf16.msra.mxu0 %v994_v23 }
 0x156   : > { %3364 = vmatprep.subr.bf16.mxu0 %v3735_v24 }
 0x15c   : > { %3357 = vmatmul.mubr.msk.bf16.vlgmr.msra.gmra.mrb[0].mxu0 %vm295_vm0, %v957_v27 }
 0x15d   : > { %3365 = vmatpush3.bf16.msra.mxu0 %v3735_v24  ;;  %3360 = vmatprep.mubr.msk.bf16.mxu0 %vm295_vm0, %v958_v29 }
 0x15e   : > { %3366 = vmatprep.subr.bf16.mxu0 %v3736_v28 }
 0x161   : > { %3367 = vmatpush3.bf16.msra.mxu0 %v3736_v28 }
 0x162   : > { %3702 = vmatprep.subr.msk.bf16.mxu0 %vm421_vm2, %v3737_v30 }
 0x164   : > { %3361 = vmatmul.mubr.msk.bf16.gmra.mrb[4].mxu0 %vm295_vm0, %v959_v33 }
 0x165   : > { %3370 = vmatprep.mubr.msk.bf16.mxu0 %vm295_vm0, %v4014_v45  ;;  %3369 = vmatpush3.bf16.msra.mxu0 %v1116_v34  ;;  %v1198_v45 = vld [vmem:[#allocation2 + $0x91] sm:$0xff]  ;;  %v1553_v34 = vld [vmem:[#allocation3 + $0x1] sm:$0xff] }
 0x166   : > { %3378 = vmatprep.subr.bf16.mxu0 %v3738_v35 }
 0x16c   : > { %3371 = vmatmul.mubr.msk.bf16.vlgmr.msra.gmra.mrb[0].mxu0 %vm295_vm0, %v4019_v47  ;;  %v3744_v47 = vld [vmem:[%s4555_s2] sm:$0xff]  }
 0x16d   : > { %3379 = vmatpush3.bf16.msra.mxu0 %v3738_v35  ;;  %3374 = vmatprep.mubr.msk.bf16.mxu0 %vm295_vm0, %v4030_v53  ;;  %v3750_v53 = vld [vmem:[%s4555_s2 + $0x18] sm:$0xff]   ;;  %v1531_v35 = vld [vmem:[#allocation3] sm:$0xff] }
 0x16e   : > { %3380 = vmatprep.subr.bf16.mxu0 %v3739_v36  ;;  %3424 = vmatprep.subr.bf16.mxu1 %v3744_v47 }
 0x16f   : > { %3425 = vmatpush3.bf16.msra.mxu1 %v3744_v47  ;;  %v3755_v47 = vld [vmem:[%s4555_s2 + $0x58] sm:$0xff]  }
 0x170   : > { %3426 = vmatprep.subr.bf16.mxu1 %v3746_v49 }
 0x171   : > { %3381 = vmatpush3.bf16.msra.mxu0 %v3739_v36 }
 0x172   : > { %3703 = vmatprep.subr.msk.bf16.mxu0 %vm421_vm2, %v3740_v38 }
 0x173   : > { %3427 = vmatpush3.bf16.msra.mxu1 %v3746_v49 }
 0x174   : > { %3375 = vmatmul.mubr.msk.bf16.gmra.mrb[4].mxu0 %vm295_vm0, %v1081_v40  ;;  %3428 = vmatprep.subr.bf16.mxu1 %v3748_v51 }
 0x175   : > { %3384 = vmatprep.mubr.msk.bf16.mxu0 %vm295_vm0, %v3977_v26  ;;  %3383 = vmatpush3.bf16.msra.mxu0 %v1237_v41  ;;  %v1202_v26 = vpack.c.bf16 %v1198_v45, %v834_v21 }
 0x176   : > { %3392 = vmatprep.subr.bf16.mxu0 %v3741_v42 }
 0x177   : > { %3429 = vmatpush3.bf16.msra.mxu1 %v3748_v51 }
 0x178   : > { %3430 = vmatprep.subr.bf16.mxu1 %v3750_v53 }
 0x17b   : > { %3431 = vmatpush3.bf16.msra.mxu1 %v3750_v53 }
 0x17c   : > { %3385 = vmatmul.mubr.msk.bf16.vlgmr.msra.gmra.mrb[0].mxu0 %vm295_vm0, %v3991_v31  ;;  %v1319_v31 = vld [vmem:[#allocation2 + $0x92] sm:$0xff]  ;;  %3432 = vmatprep.subr.bf16.mxu1 %v3752_v63 }
 0x17d   : > { %3393 = vmatpush3.bf16.msra.mxu0 %v3741_v42  ;;  %3388 = vmatprep.mubr.msk.bf16.mxu0 %vm295_vm0, %v4004_v37  ;;  %v1323_v37 = vpack.c.bf16 %v1319_v31, %v955_v32 }
 0x17e   : > { %3394 = vmatprep.subr.bf16.mxu0 %v3742_v43 }
 0x17f   : > { %3433 = vmatpush3.bf16.msra.mxu1 %v3752_v63 }
 0x180   : > { %3442 = vmatprep.subr.bf16.mxu1 %v4252_v7 }
 0x181   : > { %3395 = vmatpush3.bf16.msra.mxu0 %v3742_v43 }
 0x182   : > { %3704 = vmatprep.subr.msk.bf16.mxu0 %vm421_vm2, %v3743_v44 }
 0x184   : > { %3389 = vmatmul.mubr.msk.bf16.gmra.mrb[4].mxu0 %vm295_vm0, %v1202_v26 }
 0x185   : > { %3398 = vmatprep.mubr.msk.bf16.mxu0 %vm295_vm0, %v4048_v62  ;;  %3397 = vmatpush3.bf16.msra.mxu0 %v1358_v46 }
 0x186   : > { %3406 = vmatprep.subr.bf16.mxu0 %v3745_v48 }
 0x18c   : > { %3399 = vmatmul.mubr.msk.bf16.vlgmr.msra.gmra.mrb[0].mxu0 %vm295_vm0, %v4055_v0 }
 0x18d   : > { %3402 = vmatprep.mubr.msk.bf16.mxu0 %vm295_vm0, %v4067_v4  ;;  %3407 = vmatpush3.bf16.msra.mxu0 %v3745_v48 }
 0x18e   : > { %3408 = vmatprep.subr.bf16.mxu0 %v3747_v50 }
 0x191   : > { %3409 = vmatpush3.bf16.msra.mxu0 %v3747_v50 }
 0x192   : > { %3410 = vmatprep.subr.bf16.mxu0 %v3749_v52 }
 0x194   : > { %3403 = vmatmul.mubr.msk.bf16.gmra.mrb[4].mxu0 %vm295_vm0, %v1323_v37 }
 0x195   : > { %3411 = vmatpush3.bf16.msra.mxu0 %v3749_v52 }
 0x196   : > { %3412 = vmatprep.subr.bf16.mxu0 %v3751_v56 }
 0x199   : > { %3413 = vmatpush3.bf16.msra.mxu0 %v3751_v56 }
 0x19a   : > { %3414 = vmatprep.subr.bf16.mxu0 %v3753_v3 }
 0x19d   : > { %3415 = vmatpush3.bf16.msra.mxu0 %v3753_v3  ;;  %v3759_v3 = vld [vmem:[%s4555_s2 + $0x78] sm:$0xff]  }
 0x25f   : > { %v3400_v55 = vpop.f32.mrb[0].mxu0 }
 0x260   : > { %v1394_v58 = vpop.f32.mrb[1].mxu0  ;;  %v1440_v59 = vmul.f32 %v3400_v55, %v2967_v54  ;;  %v3756_v55 = vld [vmem:[%s4555_s2 + $0x60] sm:$0xff]  }
 0x261   : > { %v1438_v60 = vmul.f32 %v2967_v54, %v1394_v58  ;;  %v3401_v61 = vpop.f32.mrb[2].mxu0 }
 0x262   : > { %v1397_v62 = vpop.f32.mrb[3].mxu0  ;;  %v1441_v1 = vmul.f32 %v3401_v61, %v2967_v54  ;;  %v1453_v4 = vadd.f32 %v2968_v57, %v1440_v59 }
 0x263   : > { %v1451_v0 = vadd.f32 %v2968_v57, %v1438_v60  ;;  %v1439_v2 = vmul.f32 %v2967_v54, %v1397_v62 }
 0x264   : > { %v1454_v8 = vadd.f32 %v2968_v57, %v1441_v1  ;;  %v1461_v12 = vmax.f32 %v1453_v4, 0.0 }
 0x265   : > { %v1459_v5 = vmax.f32 %v1451_v0, 0.0  ;;  %v1452_v6 = vadd.f32 %v2968_v57, %v1439_v2  ;;  %v3757_v0 = vld [vmem:[%s4555_s2 + $0x68] sm:$0xff]   ;;  %v3758_v2 = vld [vmem:[%s4555_s2 + $0x70] sm:$0xff]  }
 0x266   : > { %v1462_v17 = vmax.f32 %v1454_v8, 0.0 }
 0x267   : > { %v1460_v9 = vmax.f32 %v1452_v6, 0.0  ;;  %1497 = vrot.lane.b32.xlu0 %v1459_v5, %s3800_s5  ;;  %v3404_v10 = vpop.f32.mrb[4].mxu0 }
 0x268   : > { %v1410_v11 = vpop.f32.mrb[5].mxu0  ;;  %v1444_v13 = vmul.f32 %v3404_v10, %v2967_v54 }
 0x269   : > { %v1442_v14 = vmul.f32 %v2967_v54, %v1410_v11  ;;  %1499 = vrot.lane.b32.xlu1 %v1460_v9, %s3800_s5  ;;  %v3405_v15 = vpop.f32.mrb[6].mxu0  ;;  %v3760_v9 = vld [vmem:[%s4555_s2 + $0x80] sm:$0xff]   ;;  %v3761_v11 = vld [vmem:[%s4555_s2 + $0x88] sm:$0xff]  }
 0x26a   : > { %v1413_v16 = vpop.f32.mrb[7].mxu0  ;;  %v1445_v19 = vmul.f32 %v3405_v15, %v2967_v54  ;;  %v1457_v21 = vadd.f32 %v2968_v57, %v1444_v13  ;;  %v3762_v15 = vld [vmem:[%s4555_s2 + $0x90] sm:$0xff]  }
 0x26b   : > { %v1455_v18 = vadd.f32 %v2968_v57, %v1442_v14  ;;  %v1443_v20 = vmul.f32 %v2967_v54, %v1413_v16  ;;  %1501 = vrot.lane.b32.xlu0 %v1461_v12, %s3800_s5 }
 0x26c   : > { %v1458_v24 = vadd.f32 %v2968_v57, %v1445_v19  ;;  %v1465_v27 = vmax.f32 %v1457_v21, 0.0 }
 0x26d   : > { %v1463_v22 = vmax.f32 %v1455_v18, 0.0  ;;  %v1456_v23 = vadd.f32 %v2968_v57, %v1443_v20  ;;  %1503 = vrot.lane.b32.xlu1 %v1462_v17, %s3800_s5  ;;  %v1790_v57 = vld [vmem:[#allocation3 + $0x2] sm:$0xff]  ;;  %v3763_v17 = vld [vmem:[%s4555_s2 + $0x98] sm:$0xff]  }
 0x26e   : > { %v1466_v28 = vmax.f32 %v1458_v24, 0.0  ;;  %v3764_v18 = vld [vmem:[%s4555_s2 + $0xa0] sm:$0xff]   ;;  %v3765_v20 = vld [vmem:[%s4555_s2 + $0xa8] sm:$0xff]  }
 0x26f   : > { %v1464_v25 = vmax.f32 %v1456_v23, 0.0  ;;  %1505 = vrot.lane.b32.xlu0 %v1463_v22, %s3800_s5  ;;  %v3766_v22 = vld [vmem:[%s4555_s2 + $0xb0] sm:$0xff]  }
 0x271   : > { %1507 = vrot.lane.b32.xlu1 %v1464_v25, %s3800_s5  ;;  %v3767_v25 = vld [vmem:[%s4555_s2 + $0xb8] sm:$0xff]  }
 0x273   : > { %1509 = vrot.lane.b32.xlu0 %v1465_v27, %s3800_s5 }
 0x275   : > { %1511 = vrot.lane.b32.xlu1 %v1466_v28, %s3800_s5  ;;  %v3768_v28 = vld [vmem:[%s4555_s2 + $0xc0] sm:$0xff]  }
 0x2d9   : > { %v1498_v29 = vpop.permute.xlu0 %1497 }
 0x2da   : > { %1523 = vst.msk [vmem:[#allocation3 + $0x11] sm:$0xff] %vm1522_vm6, %v1498_v29  ;;  %v3769_v29 = vld [vmem:[%s4555_s2 + $0xc8] sm:$0xff]  }
 0x2db   : > { %v1500_v30 = vpop.permute.xlu1 %1499 }
 0x2dc   : > { %1524 = vst.msk [vmem:[#allocation3 + $0x21] sm:$0xff] %vm1522_vm6, %v1500_v30 }
 0x2dd   : > { %v1502_v32 = vpop.permute.xlu0 %1501 }
 0x2de   : > { %1525 = vst.msk [vmem:[#allocation3 + $0x31] sm:$0xff] %vm1522_vm6, %v1502_v32  ;;  %v3770_v32 = vld [vmem:[%s4555_s2 + $0xd0] sm:$0xff]  }
 0x2df   : > { %v1504_v33 = vpop.permute.xlu1 %1503 }
 0x2e0   : > { %1526 = vst.msk [vmem:[#allocation3 + $0x41] sm:$0xff] %vm1522_vm6, %v1504_v33 }
 0x2e1   : > { %v1506_v36 = vpop.permute.xlu0 %1505  ;;  %v4259_v38 = vld [vmem:[#allocation3 + $0x11] sm:$0xff] }
 0x2e2   : > { %v4261_v39 = vld [vmem:[#allocation3 + $0x10] sm:$0xff]  ;;  %1527 = vst.msk [vmem:[#allocation3 + $0x51] sm:$0xff] %vm1522_vm6, %v1506_v36  ;;  %v1561_v40 = vpack.c.bf16 %v4259_v38, %v1553_v34  ;;  %v3771_v34 = vld [vmem:[%s4555_s2 + $0xd8] sm:$0xff]  }
 0x2e3   : > { %v1539_v41 = vpack.c.bf16 %v4261_v39, %v1531_v35  ;;  %v1508_v42 = vpop.permute.xlu1 %1507  ;;  %v4269_v43 = vld [vmem:[#allocation3 + $0x21] sm:$0xff]  ;;  %v4320_v58 = vld [vmem:[#allocation3 + $0x12] sm:$0xff] }
 0x2e4   : > { %1528 = vst.msk [vmem:[#allocation3 + $0x61] sm:$0xff] %vm1522_vm6, %v1508_v42  ;;  %3416 = vmatprep.mubr.msk.bf16.mxu0 %vm1467_vm4, %v1561_v40  ;;  %v4273_v26 = vld [vmem:[#allocation3 + $0x20] sm:$0xff]  ;;  %v1798_v1 = vpack.c.bf16 %v4320_v58, %v1790_v57  ;;  %v2074_v27 = vpack.c.bf16 %v4269_v43, %v4259_v38  ;;  %v3773_v40 = vld [vmem:[%s4555_s2 + $0xe8] sm:$0xff]  }
 0x2e5   : > { %3434 = vmatprep.mubr.msk.bf16.mxu1 %vm1467_vm4, %v1539_v41  ;;  %v1510_v44 = vpop.permute.xlu0 %1509  ;;  %v4271_v45 = vld [vmem:[#allocation3 + $0x31] sm:$0xff]  ;;  %v4349_v6 = vld [vmem:[#allocation3 + $0x22] sm:$0xff]  ;;  %v1936_v16 = vpack.c.bf16 %v4273_v26, %v4261_v39 }
 0x2e6   : > { %v4275_v46 = vld [vmem:[#allocation3 + $0x30] sm:$0xff]  ;;  %1529 = vst.msk [vmem:[#allocation3 + $0x71] sm:$0xff] %vm1522_vm6, %v1510_v44  ;;  %v4280_v31 = vpack.c.bf16 %v4271_v45, %v4269_v43  ;;  %v3772_v38 = vld [vmem:[%s4555_s2 + $0xe0] sm:$0xff]   ;;  %v2212_v39 = vpack.c.bf16 %v4349_v6, %v4320_v58  ;;  %v3775_v43 = vld [vmem:[%s4555_s2 + $0xf8] sm:$0xff]  }
 0x2e7   : > { %v4284_v37 = vpack.c.bf16 %v4275_v46, %v4273_v26  ;;  %v1512_v48 = vpop.permute.xlu1 %1511  ;;  %v4294_v49 = vld [vmem:[#allocation3 + $0x41] sm:$0xff]  ;;  %v4345_v4 = vld [vmem:[#allocation3 + $0x32] sm:$0xff] }
 0x2e8   : > { %1530 = vst.msk [vmem:[#allocation3 + $0x81] sm:$0xff] %vm1522_vm6, %v1512_v48  ;;  %3417 = vmatmul.mubr.msk.bf16.vlgmr.msra.gmra.mrb[8].mxu0 %vm1467_vm4, %v4280_v31  ;;  %v4299_v51 = vld [vmem:[#allocation3 + $0x40] sm:$0xff]  ;;  %v2075_v30 = vpack.c.bf16 %v4294_v49, %v4271_v45  ;;  %v3774_v41 = vld [vmem:[%s4555_s2 + $0xf0] sm:$0xff]   ;;  %v3785_v57 = vld [vmem:[%s4555_s2 + $0x148] sm:$0xff]  }
 0x2e9   : > { %3435 = vmatmul.mubr.msk.bf16.vlgmr.msra.gmra.mrb[0].mxu1 %vm1467_vm4, %v4284_v37  ;;  %v4297_v50 = vld [vmem:[#allocation3 + $0x51] sm:$0xff]  ;;  %v4355_v8 = vld [vmem:[#allocation3 + $0x42] sm:$0xff]  ;;  %v1937_v19 = vpack.c.bf16 %v4299_v51, %v4275_v46 }
 0x2ea   : > { %3443 = vmatpush3.bf16.msra.mxu1 %v4252_v7  ;;  %v4301_v52 = vld [vmem:[#allocation3 + $0x50] sm:$0xff]  ;;  %v4305_v54 = vpack.c.bf16 %v4297_v50, %v4294_v49  ;;  %v4353_v7 = vpack.c.bf16 %v4345_v4, %v4349_v6  ;;  %v2213_v42 = vpack.c.bf16 %v4355_v8, %v4345_v4  ;;  %v3776_v45 = vld [vmem:[%s4555_s2 + $0x100] sm:$0xff]   ;;  %v3779_v49 = vld [vmem:[%s4555_s2 + $0x118] sm:$0xff]  }
 0x2eb   : > { %3444 = vmatprep.subr.bf16.mxu1 %v3755_v47  ;;  %v4309_v53 = vpack.c.bf16 %v4301_v52, %v4299_v51  ;;  %v4318_v56 = vld [vmem:[#allocation3 + $0x61] sm:$0xff]  ;;  %v4347_v5 = vld [vmem:[#allocation3 + $0x52] sm:$0xff] }
 0x2ec   : > { %3420 = vmatprep.mubr.msk.bf16.mxu0 %vm1467_vm4, %v4305_v54  ;;  %v1537_v60 = vld [vmem:[#allocation3 + $0x60] sm:$0xff]  ;;  %v4362_v10 = vpack.c.bf16 %v4347_v5, %v4355_v8  ;;  %v2076_v33 = vpack.c.bf16 %v4318_v56, %v4297_v50  ;;  %v3778_v48 = vld [vmem:[%s4555_s2 + $0x110] sm:$0xff]  }
 0x2ed   : > { %3438 = vmatprep.mubr.msk.bf16.mxu1 %vm1467_vm4, %v4309_v53  ;;  %v4322_v59 = vld [vmem:[#allocation3 + $0x71] sm:$0xff]  ;;  %v4373_v13 = vld [vmem:[#allocation3 + $0x62] sm:$0xff]  ;;  %v1938_v21 = vpack.c.bf16 %v1537_v60, %v4301_v52 }
 0x2ee   : > { %3445 = vmatpush3.bf16.msra.mxu1 %v3755_v47  ;;  %v1538_v61 = vld [vmem:[#allocation3 + $0x70] sm:$0xff]  ;;  %v4326_v62 = vpack.c.bf16 %v4322_v59, %v4318_v56  ;;  %v2214_v44 = vpack.c.bf16 %v4373_v13, %v4347_v5  ;;  %v3777_v47 = vld [vmem:[%s4555_s2 + $0x108] sm:$0xff]   ;;  %v3780_v50 = vld [vmem:[%s4555_s2 + $0x120] sm:$0xff]  }
 0x2ef   : > { %3446 = vmatprep.subr.bf16.mxu1 %v3756_v55  ;;  %v4328_v63 = vpack.c.bf16 %v1538_v61, %v1537_v60  ;;  %v4371_v12 = vld [vmem:[#allocation3 + $0x72] sm:$0xff]  ;;  %v4404_v23 = vld [vmem:[#allocation3 + $0x80] sm:$0xff] }
 0x2f0   : > { %3421 = vmatmul.mubr.msk.bf16.gmra.mrb[12].mxu0 %vm1467_vm4, %v4326_v62  ;;  %v4377_v14 = vpack.c.bf16 %v4371_v12, %v4373_v13  ;;  %v1939_v24 = vpack.c.bf16 %v4404_v23, %v1538_v61  ;;  %v4432_v35 = vld [vmem:[#allocation3 + $0x81] sm:$0xff]  ;;  %v2350_v51 = vld [vmem:[#allocation3 + $0x90] sm:$0xff]  ;;  %v3787_v60 = vld [vmem:[%s4555_s2 + $0x158] sm:$0xff]  }
 0x2f1   : > { %3439 = vmatmul.mubr.msk.bf16.gmra.mrb[4].mxu1 %vm1467_vm4, %v4328_v63  ;;  %v2077_v36 = vpack.c.bf16 %v4432_v35, %v4322_v59  ;;  %v2211_v26 = vld [vmem:[#allocation3 + $0x82] sm:$0xff]  ;;  %v2354_v52 = vpack.c.bf16 %v2350_v51, %v4404_v23  ;;  %v2488_v58 = vld [vmem:[#allocation3 + $0x91] sm:$0xff] }
 0x2f2   : > { %3447 = vmatpush3.bf16.msra.mxu1 %v3756_v55  ;;  %3452 = vmatprep.mubr.msk.bf16.mxu1 %vm1467_vm4, %v1798_v1  ;;  %v2215_v46 = vpack.c.bf16 %v2211_v26, %v4371_v12  ;;  %v3782_v55 = vld [vmem:[%s4555_s2 + $0x130] sm:$0xff]   ;;  %v3784_v56 = vld [vmem:[%s4555_s2 + $0x140] sm:$0xff]   ;;  %v2492_v59 = vpack.c.bf16 %v2488_v58, %v4432_v35 }
 0x2f3   : > { %3448 = vmatprep.subr.bf16.mxu1 %v3757_v0  ;;  %v2626_v61 = vld [vmem:[#allocation3 + $0x92] sm:$0xff]  ;;  %v3130_v8 = vld [vmem:[%s4556_s3 + $0x2] ss:$0 sm:$0xff] }
 0x2f6   : > { %3449 = vmatpush3.bf16.msra.mxu1 %v3757_v0 }
 0x2f7   : > { %3450 = vmatprep.subr.bf16.mxu1 %v3758_v2 }
 0x2fa   : > { %3451 = vmatpush3.bf16.msra.mxu1 %v3758_v2 }
 0x2fb   : > { %3460 = vmatprep.subr.bf16.mxu1 %v3759_v3 }
 0x2fd   : > { %3453 = vmatmul.mubr.msk.bf16.vlgmr.msra.gmra.mrb[0].mxu1 %vm1467_vm4, %v4353_v7 }
 0x2fe   : > { %3456 = vmatprep.mubr.msk.bf16.mxu1 %vm1467_vm4, %v4362_v10  ;;  %3461 = vmatpush3.bf16.msra.mxu1 %v3759_v3 }
 0x2ff   : > { %3462 = vmatprep.subr.bf16.mxu1 %v3760_v9 }
 0x302   : > { %3463 = vmatpush3.bf16.msra.mxu1 %v3760_v9 }
 0x303   : > { %3464 = vmatprep.subr.bf16.mxu1 %v3761_v11 }
 0x305   : > { %3457 = vmatmul.mubr.msk.bf16.gmra.mrb[4].mxu1 %vm1467_vm4, %v4377_v14 }
 0x306   : > { %3465 = vmatpush3.bf16.msra.mxu1 %v3761_v11  ;;  %3470 = vmatprep.mubr.msk.bf16.mxu1 %vm1467_vm4, %v1936_v16  ;;  %v3131_v11 = vld [vmem:[%s4556_s3 + $0x3] ss:$0 sm:$0xff] }
 0x307   : > { %3466 = vmatprep.subr.bf16.mxu1 %v3762_v15 }
 0x30a   : > { %3467 = vmatpush3.bf16.msra.mxu1 %v3762_v15 }
 0x30b   : > { %3468 = vmatprep.subr.bf16.mxu1 %v3763_v17 }
 0x30e   : > { %3469 = vmatpush3.bf16.msra.mxu1 %v3763_v17 }
 0x30f   : > { %3478 = vmatprep.subr.bf16.mxu1 %v3764_v18 }
 0x311   : > { %3471 = vmatmul.mubr.msk.bf16.vlgmr.msra.gmra.mrb[0].mxu1 %vm1467_vm4, %v1937_v19 }
 0x312   : > { %3474 = vmatprep.mubr.msk.bf16.mxu1 %vm1467_vm4, %v1938_v21  ;;  %3479 = vmatpush3.bf16.msra.mxu1 %v3764_v18 }
 0x313   : > { %3480 = vmatprep.subr.bf16.mxu1 %v3765_v20 }
 0x316   : > { %3481 = vmatpush3.bf16.msra.mxu1 %v3765_v20 }
 0x317   : > { %3482 = vmatprep.subr.bf16.mxu1 %v3766_v22 }
 0x319   : > { %3475 = vmatmul.mubr.msk.bf16.gmra.mrb[4].mxu1 %vm1467_vm4, %v1939_v24 }
 0x31a   : > { %3483 = vmatpush3.bf16.msra.mxu1 %v3766_v22  ;;  %3488 = vmatprep.mubr.msk.bf16.mxu1 %vm1467_vm4, %v2074_v27 }
 0x31b   : > { %3484 = vmatprep.subr.bf16.mxu1 %v3767_v25 }
 0x31e   : > { %3485 = vmatpush3.bf16.msra.mxu1 %v3767_v25 }
 0x31f   : > { %3486 = vmatprep.subr.bf16.mxu1 %v3768_v28 }
 0x322   : > { %3487 = vmatpush3.bf16.msra.mxu1 %v3768_v28 }
 0x323   : > { %3496 = vmatprep.subr.bf16.mxu1 %v3769_v29 }
 0x325   : > { %3489 = vmatmul.mubr.msk.bf16.vlgmr.msra.gmra.mrb[0].mxu1 %vm1467_vm4, %v2075_v30 }
 0x326   : > { %3492 = vmatprep.mubr.msk.bf16.mxu1 %vm1467_vm4, %v2076_v33  ;;  %3497 = vmatpush3.bf16.msra.mxu1 %v3769_v29 }
 0x327   : > { %3498 = vmatprep.subr.bf16.mxu1 %v3770_v32 }
 0x32a   : > { %3499 = vmatpush3.bf16.msra.mxu1 %v3770_v32 }
 0x32b   : > { %3500 = vmatprep.subr.bf16.mxu1 %v3771_v34 }
 0x32d   : > { %3493 = vmatmul.mubr.msk.bf16.gmra.mrb[4].mxu1 %vm1467_vm4, %v2077_v36 }
 0x32e   : > { %3501 = vmatpush3.bf16.msra.mxu1 %v3771_v34  ;;  %3506 = vmatprep.mubr.msk.bf16.mxu1 %vm1467_vm4, %v2212_v39 }
 0x32f   : > { %3502 = vmatprep.subr.bf16.mxu1 %v3772_v38 }
 0x332   : > { %3503 = vmatpush3.bf16.msra.mxu1 %v3772_v38 }
 0x333   : > { %3504 = vmatprep.subr.bf16.mxu1 %v3773_v40 }
 0x336   : > { %3505 = vmatpush3.bf16.msra.mxu1 %v3773_v40 }
 0x337   : > { %3514 = vmatprep.subr.bf16.mxu1 %v3774_v41 }
 0x339   : > { %3507 = vmatmul.mubr.msk.bf16.vlgmr.msra.gmra.mrb[0].mxu1 %vm1467_vm4, %v2213_v42 }
 0x33a   : > { %3510 = vmatprep.mubr.msk.bf16.mxu1 %vm1467_vm4, %v2214_v44  ;;  %3515 = vmatpush3.bf16.msra.mxu1 %v3774_v41 }
 0x33b   : > { %3516 = vmatprep.subr.bf16.mxu1 %v3775_v43 }
 0x33e   : > { %3517 = vmatpush3.bf16.msra.mxu1 %v3775_v43 }
 0x33f   : > { %3518 = vmatprep.subr.bf16.mxu1 %v3776_v45 }
 0x341   : > { %3511 = vmatmul.mubr.msk.bf16.gmra.mrb[4].mxu1 %vm1467_vm4, %v2215_v46 }
 0x342   : > { %3519 = vmatpush3.bf16.msra.mxu1 %v3776_v45  ;;  %3524 = vmatprep.mubr.msk.bf16.mxu1 %vm1467_vm4, %v4284_v37  ;;  %v3781_v37 = vld [vmem:[%s4555_s2 + $0x128] sm:$0xff]  }
 0x343   : > { %3520 = vmatprep.subr.bf16.mxu1 %v3777_v47 }
 0x346   : > { %3521 = vmatpush3.bf16.msra.mxu1 %v3777_v47 }
 0x347   : > { %3522 = vmatprep.subr.bf16.mxu1 %v3778_v48 }
 0x34a   : > { %3523 = vmatpush3.bf16.msra.mxu1 %v3778_v48 }
 0x34b   : > { %3532 = vmatprep.subr.bf16.mxu1 %v3779_v49 }
 0x34d   : > { %3525 = vmatmul.mubr.msk.bf16.vlgmr.msra.gmra.mrb[0].mxu1 %vm1467_vm4, %v4309_v53  ;;  %v3783_v53 = vld [vmem:[%s4555_s2 + $0x138] sm:$0xff]  }
 0x34e   : > { %3528 = vmatprep.mubr.msk.bf16.mxu1 %vm1467_vm4, %v4328_v63  ;;  %3533 = vmatpush3.bf16.msra.mxu1 %v3779_v49 }
 0x34f   : > { %3534 = vmatprep.subr.bf16.mxu1 %v3780_v50 }
 0x352   : > { %3535 = vmatpush3.bf16.msra.mxu1 %v3780_v50 }
 0x353   : > { %3536 = vmatprep.subr.bf16.mxu1 %v3781_v37 }
 0x355   : > { %3529 = vmatmul.mubr.msk.bf16.gmra.mrb[4].mxu1 %vm1467_vm4, %v2354_v52 }
 0x356   : > { %3537 = vmatpush3.bf16.msra.mxu1 %v3781_v37  ;;  %3542 = vmatprep.mubr.msk.bf16.mxu1 %vm1467_vm4, %v4280_v31  ;;  %v3786_v31 = vld [vmem:[%s4555_s2 + $0x150] sm:$0xff]  }
 0x357   : > { %3538 = vmatprep.subr.bf16.mxu1 %v3782_v55 }
 0x35a   : > { %3539 = vmatpush3.bf16.msra.mxu1 %v3782_v55 }
 0x35b   : > { %3540 = vmatprep.subr.bf16.mxu1 %v3783_v53 }
 0x35e   : > { %3541 = vmatpush3.bf16.msra.mxu1 %v3783_v53 }
 0x35f   : > { %3550 = vmatprep.subr.bf16.mxu1 %v3784_v56 }
 0x361   : > { %3543 = vmatmul.mubr.msk.bf16.vlgmr.msra.gmra.mrb[0].mxu1 %vm1467_vm4, %v4305_v54  ;;  %v3788_v54 = vld [vmem:[%s4555_s2 + $0x160] sm:$0xff]  }
 0x362   : > { %3546 = vmatprep.mubr.msk.bf16.mxu1 %vm1467_vm4, %v4326_v62  ;;  %3551 = vmatpush3.bf16.msra.mxu1 %v3784_v56  ;;  %v2630_v62 = vpack.c.bf16 %v2626_v61, %v2211_v26 }
 0x363   : > { %3552 = vmatprep.subr.bf16.mxu1 %v3785_v57 }
 0x366   : > { %3553 = vmatpush3.bf16.msra.mxu1 %v3785_v57 }
 0x367   : > { %3554 = vmatprep.subr.bf16.mxu1 %v3786_v31 }
 0x369   : > { %3547 = vmatmul.mubr.msk.bf16.gmra.mrb[4].mxu1 %vm1467_vm4, %v2492_v59 }
 0x36a   : > { %3555 = vmatpush3.bf16.msra.mxu1 %v3786_v31  ;;  %3560 = vmatprep.mubr.msk.bf16.mxu1 %vm1467_vm4, %v4353_v7 }
 0x36b   : > { %3556 = vmatprep.subr.bf16.mxu1 %v3787_v60 }
 0x36e   : > { %3557 = vmatpush3.bf16.msra.mxu1 %v3787_v60 }
 0x36f   : > { %3558 = vmatprep.subr.bf16.mxu1 %v3788_v54 }
 0x372   : > { %3559 = vmatpush3.bf16.msra.mxu1 %v3788_v54 }
 0x375   : > { %3561 = vmatmul.mubr.msk.bf16.vlgmr.msra.gmra.mrb[0].mxu1 %vm1467_vm4, %v4362_v10 }
 0x376   : > { %3564 = vmatprep.mubr.msk.bf16.mxu1 %vm1467_vm4, %v4377_v14 }
 0x37d   : > { %3565 = vmatmul.mubr.msk.bf16.gmra.mrb[4].mxu1 %vm1467_vm4, %v2630_v62 }
 0x3bb   : > { %v3418_v63 = vpop.f32.mrb[8].mxu0 }
 0x3bc   : > { %v1652_v0 = vpop.f32.mrb[9].mxu0 }
 0x3bd   : > { %v3419_v1 = vpop.f32.mrb[10].mxu0 }
 0x3be   : > { %v1655_v2 = vpop.f32.mrb[11].mxu0 }
 0x3c3   : > { %v3422_v3 = vpop.f32.mrb[12].mxu0 }
 0x3c4   : > { %v1668_v4 = vpop.f32.mrb[13].mxu0 }
 0x3c5   : > { %v3423_v5 = vpop.f32.mrb[14].mxu0 }
 0x3c6   : > { %v1671_v6 = vpop.f32.mrb[15].mxu0 }
 0x448   : > { %v3562_v7 = vpop.f32.mrb[0].mxu1 }
 0x449   : > { %v3568_v9 = vadd.f32 %v3562_v7, %v3418_v63  ;;  %v2718_v10 = vpop.f32.mrb[1].mxu1 }
 0x44a   : > { %v3569_v12 = vadd.f32 %v2718_v10, %v1652_v0  ;;  %v3563_v13 = vpop.f32.mrb[2].mxu1 }
 0x44b   : > { %v2764_v14 = vmul.f32 %v3568_v9, %v3130_v8  ;;  %v3570_v15 = vadd.f32 %v3563_v13, %v3419_v1  ;;  %v2721_v16 = vpop.f32.mrb[3].mxu1 }
 0x44c   : > { %v2762_v17 = vmul.f32 %v3569_v12, %v3130_v8  ;;  %v3571_v18 = vadd.f32 %v2721_v16, %v1655_v2 }
 0x44d   : > { %v2777_v19 = vadd.f32 %v3131_v11, %v2764_v14  ;;  %v2765_v20 = vmul.f32 %v3570_v15, %v3130_v8 }
 0x44e   : > { %v2775_v21 = vadd.f32 %v3131_v11, %v2762_v17  ;;  %v2763_v22 = vmul.f32 %v3571_v18, %v3130_v8 }
 0x44f   : > { %v2785_v23 = vmax.f32 %v2777_v19, 0.0  ;;  %v2778_v24 = vadd.f32 %v3131_v11, %v2765_v20 }
 0x450   : > { %v2783_v25 = vmax.f32 %v2775_v21, 0.0  ;;  %v2776_v27 = vadd.f32 %v3131_v11, %v2763_v22  ;;  %v3566_v28 = vpop.f32.mrb[4].mxu1 }
 0x451   : > { %2794 = vst.msk [vmem:[%s4532_s9 + $0x10] sm:$0xff] %vm2791_vm7, %v2785_v23  ;;  %v2786_v29 = vmax.f32 %v2778_v24, 0.0  ;;  %v3572_v30 = vadd.f32 %v3566_v28, %v3422_v3  ;;  %v2734_v32 = vpop.f32.mrb[5].mxu1 }
 0x452   : > { %2792 = vst.msk [vmem:[%s4532_s9] sm:$0xff] %vm2791_vm7, %v2783_v25  ;;  %v2784_v33 = vmax.f32 %v2776_v27, 0.0  ;;  %v3573_v34 = vadd.f32 %v2734_v32, %v1668_v4  ;;  %v3567_v35 = vpop.f32.mrb[6].mxu1 }
 0x453   : > { %2795 = vst.msk [vmem:[%s4532_s9 + $0x18] sm:$0xff] %vm2791_vm7, %v2786_v29  ;;  %v2768_v36 = vmul.f32 %v3572_v30, %v3130_v8  ;;  %v3574_v38 = vadd.f32 %v3567_v35, %v3423_v5  ;;  %v2737_v39 = vpop.f32.mrb[7].mxu1 }
 0x454   : > { %2793 = vst.msk [vmem:[%s4532_s9 + $0x8] sm:$0xff] %vm2791_vm7, %v2784_v33  ;;  %v2766_v40 = vmul.f32 %v3573_v34, %v3130_v8  ;;  %v3575_v41 = vadd.f32 %v2737_v39, %v1671_v6 }
 0x455   : > { %v2781_v42 = vadd.f32 %v3131_v11, %v2768_v36  ;;  %v2769_v43 = vmul.f32 %v3574_v38, %v3130_v8 }
 0x456   : > { %v2779_v44 = vadd.f32 %v3131_v11, %v2766_v40  ;;  %v2767_v45 = vmul.f32 %v3575_v41, %v3130_v8 }
 0x457   : > { %v2789_v26 = vmax.f32 %v2781_v42, 0.0  ;;  %v2782_v46 = vadd.f32 %v3131_v11, %v2769_v43 }
 0x458   : > { %v2787_v47 = vmax.f32 %v2779_v44, 0.0  ;;  %v2780_v48 = vadd.f32 %v3131_v11, %v2767_v45 }
 0x459   : > { %2798 = vst.msk [vmem:[%s4532_s9 + $0x30] sm:$0xff] %vm2791_vm7, %v2789_v26  ;;  %v2790_v49 = vmax.f32 %v2782_v46, 0.0 }
 0x45a   : > { %2796 = vst.msk [vmem:[%s4532_s9 + $0x20] sm:$0xff] %vm2791_vm7, %v2787_v47  ;;  %v2788_v50 = vmax.f32 %v2780_v48, 0.0 }
 0x45b   : > { %2799 = vst.msk [vmem:[%s4532_s9 + $0x38] sm:$0xff] %vm2791_vm7, %v2790_v49 }
 0x45c   : > { %2797 = vst.msk [vmem:[%s4532_s9 + $0x28] sm:$0xff] %vm2791_vm7, %v2788_v50 }
 0x45d PF: > { %s14_s15 = sadd.s32 1, %s3795_s15  }
 0x45e   : > { %p11_p4 = scmp.ge.s32.totalorder %s14_s15, 4  }
 0x460   :  { %13 = sbr.rel (!%p11_p4) target bundleno = 1 (0x1), region = 86 }

</bundles_post_ra>
